<compile_context>
chip_gen: v5e
topology: v5e:2x2
jax: 0.10.0
libtpu: 0.0.40
codegen_flags: <defaults>
</compile_context>

<pallas_src>
import math
import functools

import jax
import jax.numpy as jnp
from jax import lax
from jax.experimental import pallas as pl
from jax.experimental.pallas import tpu as pltpu


def seqnet_kernel(
    x_ref,            # (B, 784)  flattened image batch (constant-current encoder)
    w0_ref, b0_ref,   # fc0 with bn0 folded in: (784, H) f32, (1, H) f32
    w1_ref, b1_ref,   # fc1 with bn1 folded in: (H, H)  bf16, (1, H) f32
    w2_ref, b2_ref,   # fc2 with bnout folded : (H, 10) bf16, (1, 10) f32
    logp_ref,         # (B, 10) output log_p_y
    *, seq_length, decay, v_th, tau_syn_inv, tau_mem_inv, seed,
):
    B = x_ref.shape[0]
    H = w0_ref.shape[1]
    n_out = w2_ref.shape[1]

    # --- fc0 + bn0, hoisted: input is time-invariant under the constant-current
    # encoder, so this 784xH matmul runs exactly once. ------------------------
    z0 = jnp.dot(x_ref[...], w0_ref[...],
                 preferred_element_type=jnp.float32) + b0_ref[...]

    w1 = w1_ref[...]
    b1 = b1_ref[...]
    w2 = w2_ref[...]
    b2 = b2_ref[...]

    # Per-element counter for the hash RNG (hoisted; reused for both layers).
    idx = (lax.broadcasted_iota(jnp.int32, (B, H), 0) * H
           + lax.broadcasted_iota(jnp.int32, (B, H), 1)).astype(jnp.uint32)
    seed_u = jnp.uint32(seed & 0xFFFFFFFF)

    def bernoulli(p, key_u32):
        # lowbias32-style integer hash of (element index, timestep/layer key).
        x = idx ^ (key_u32 * jnp.uint32(0x9E3779B9))
        x = (x ^ (x >> 16)) * jnp.uint32(0x7FEB352D)
        x = (x ^ (x >> 15)) * jnp.uint32(0x846CA68B)
        x = x ^ (x >> 16)
        # 24-bit uniform compared directly against p * 2^24 (no [0,1) rescale).
        u24 = (x >> 8).astype(jnp.float32)
        return (u24 < p * 16777216.0).astype(jnp.float32)

    def step(t, carry):
        v0, v1, li_i, li_v, vmax = carry
        key0 = seed_u + jnp.asarray(t, jnp.uint32) * jnp.uint32(2)
        key1 = key0 + jnp.uint32(1)

        # --- stoch0: membrane decay + Bernoulli spike + reset ----------------
        v0 = decay * v0 + z0
        s0 = bernoulli(jax.nn.sigmoid(v0 - v_th), key0)
        v0 = v0 * (1.0 - s0)

        # --- fc1 (+bn1 folded) -> stoch1 -------------------------------------
        z1 = jnp.dot(s0.astype(w1.dtype), w1,
                     preferred_element_type=jnp.float32) + b1
        v1 = decay * v1 + z1
        s1 = bernoulli(jax.nn.sigmoid(v1 - v_th), key1)
        v1 = v1 * (1.0 - s1)

        # --- fc2 (+bnout folded) -> LI readout (no weights) ------------------
        z2 = jnp.dot(s1.astype(w2.dtype), w2,
                     preferred_element_type=jnp.float32) + b2
        li_i = li_i + tau_syn_inv * (z2 - li_i)
        li_v = li_v + tau_mem_inv * (li_i - li_v)

        # Decoder part 1: running max over time of the readout voltage.
        vmax = jnp.maximum(vmax, li_v)
        return (v0, v1, li_i, li_v, vmax)

    zeros_h = jnp.zeros((B, H), jnp.float32)
    zeros_o = jnp.zeros((B, n_out), jnp.float32)
    carry = (zeros_h, zeros_h, zeros_o, zeros_o,
             jnp.full((B, n_out), -jnp.inf, jnp.float32))

    if seq_length <= 16:
        # Fully unroll short sequences at trace time (scheduler visibility).
        for t in range(seq_length):
            carry = step(t, carry)
    else:
        carry = lax.fori_loop(0, seq_length, step, carry)

    _, _, _, _, vmax = carry

    # Decoder part 2: log_softmax over the 10 classes.
    m = jnp.max(vmax, axis=-1, keepdims=True)
    lse = m + jnp.log(jnp.sum(jnp.exp(vmax - m), axis=-1, keepdims=True))
    logp_ref[...] = vmax - lse


def model_forward(x_img, params, *, seq_length, hidden, beta=5.0, seed=1234):
    """encoder -> SeqNet -> decoder; SNN time loop + decoder fused in Pallas."""
    B = x_img.shape[0]
    feat = 28 * 28
    n_out = 10

    # Pad batch to a multiple of 8 (sublane) for clean vreg/MXU tiling.
    B_pad = max(8, ((B + 7) // 8) * 8)
    x_flat = x_img.reshape(B, feat).astype(jnp.float32)
    if B_pad != B:
        x_flat = jnp.pad(x_flat, ((0, B_pad - B), (0, 0)))

    # Fold eval-mode BatchNorm into the Linear weights / biases (one-time XLA).
    w0 = (params["w0"] * params["sc0"]).astype(jnp.float32)
    b0 = (params["b0"] * params["sc0"] + params["sh0"]).astype(jnp.float32)
    w1 = (params["w1"] * params["sc1"]).astype(jnp.bfloat16)   # bf16 for MXU
    b1 = (params["b1"] * params["sc1"] + params["sh1"]).astype(jnp.float32)
    w2 = (params["w2"] * params["sc2"]).astype(jnp.bfloat16)   # bf16 for MXU
    b2 = (params["b2"] * params["sc2"] + params["sh2"]).astype(jnp.float32)

    decay = math.exp(-1.0 / float(beta))   # membrane decay derived from beta

    kernel = functools.partial(
        seqnet_kernel,
        seq_length=seq_length,
        decay=decay,
        v_th=1.0,
        tau_syn_inv=0.2,
        tau_mem_inv=0.1,
        seed=seed,
    )

    vmem = pl.BlockSpec(memory_space=pltpu.MemorySpace.VMEM)
    logp = pl.pallas_call(
        kernel,
        out_shape=jax.ShapeDtypeStruct((B_pad, n_out), jnp.float32),
        in_specs=[vmem] * 7,          # whole arrays resident in VMEM, no grid
        out_specs=vmem,
    )(x_flat, w0, b0, w1, b1, w2, b2)

    return logp[:B]                   # drop batch-padding rows


def _init_params(key, hidden):
    feat = 28 * 28
    n_out = 10

    def folded_bn(k, n):
        k1, k2, k3, k4 = jax.random.split(k, 4)
        gamma = jax.random.uniform(k1, (n,), jnp.float32, 0.8, 1.2)
        beta_ = 0.1 * jax.random.normal(k2, (n,), jnp.float32)
        mean = 0.1 * jax.random.normal(k3, (n,), jnp.float32)
        var = jax.random.uniform(k4, (n,), jnp.float32, 0.5, 1.5)
        scale = gamma / jnp.sqrt(var + 1e-5)
        shift = beta_ - mean * scale
        return scale.reshape(1, n), shift.reshape(1, n)

    ks = jax.random.split(key, 9)
    p = {}
    p["w0"] = jax.random.normal(ks[0], (feat, hidden), jnp.float32) / math.sqrt(feat)
    p["b0"] = (0.01 * jax.random.normal(ks[1], (hidden,), jnp.float32)).reshape(1, hidden)
    p["sc0"], p["sh0"] = folded_bn(ks[2], hidden)

    p["w1"] = jax.random.normal(ks[3], (hidden, hidden), jnp.float32) / math.sqrt(hidden)
    p["b1"] = (0.01 * jax.random.normal(ks[4], (hidden,), jnp.float32)).reshape(1, hidden)
    p["sc1"], p["sh1"] = folded_bn(ks[5], hidden)

    p["w2"] = jax.random.normal(ks[6], (hidden, n_out), jnp.float32) / math.sqrt(hidden)
    p["b2"] = (0.01 * jax.random.normal(ks[7], (n_out,), jnp.float32)).reshape(1, n_out)
    p["sc2"], p["sh2"] = folded_bn(ks[8], n_out)
    return p


if __name__ == "__main__":
    BATCH = 2
    SEQ = 8
    HIDDEN = 128   # small, 128-aligned stand-in for the script's hidden=500

    key = jax.random.PRNGKey(0)
    k_x, k_p = jax.random.split(key)
    x = jax.random.uniform(k_x, (BATCH, 28, 28), jnp.float32)   # input image batch
    params = _init_params(k_p, HIDDEN)

    log_p_y = model_forward(x, params, seq_length=SEQ, hidden=HIDDEN, beta=5.0)
    log_p_y = jax.block_until_ready(log_p_y)

    assert log_p_y.shape == (BATCH, 10)
    assert bool(jnp.all(jnp.isfinite(log_p_y)))
    # log_softmax rows must (log-)sum to ~1
    assert bool(jnp.allclose(jnp.sum(jnp.exp(log_p_y), axis=-1), 1.0, atol=1e-4))
    print("KERNEL_OK")
</pallas_src>

<mosaic_0001>
module attributes {stable_mosaic.version = 11 : i64} {
  func.func @seqnet_kernel(%arg0: memref<8x784xf32, #tpu.memory_space<vmem>>, %arg1: memref<784x128xf32, #tpu.memory_space<vmem>>, %arg2: memref<1x128xf32, #tpu.memory_space<vmem>>, %arg3: memref<128x128xbf16, #tpu.memory_space<vmem>>, %arg4: memref<1x128xf32, #tpu.memory_space<vmem>>, %arg5: memref<128x10xbf16, #tpu.memory_space<vmem>>, %arg6: memref<1x10xf32, #tpu.memory_space<vmem>>, %arg7: memref<8x10xf32, #tpu.memory_space<vmem>>) attributes {dimension_semantics = [], scalar_prefetch = 0 : i64, scratch_operands = 0 : i64, tpu.core_type = #tpu.core_type<tc>} {
    %c0 = arith.constant 0 : index
    %c0_0 = arith.constant 0 : index
    %0 = vector.load %arg0[%c0, %c0_0] : memref<8x784xf32, #tpu.memory_space<vmem>>, vector<8x784xf32>
    %c0_1 = arith.constant 0 : index
    %c0_2 = arith.constant 0 : index
    %1 = vector.load %arg1[%c0_1, %c0_2] : memref<784x128xf32, #tpu.memory_space<vmem>>, vector<784x128xf32>
    %cst = arith.constant dense<0.000000e+00> : vector<8x128xf32>
    %2 = tpu.matmul %0, %1, %cst {dimension_numbers = #tpu.dot_dimension_numbers<[1], [0], [0], [1], [0, 0, 1, 1], [], []>} : vector<8x784xf32>, vector<784x128xf32>, vector<8x128xf32> -> vector<8x128xf32>
    %c0_3 = arith.constant 0 : index
    %c0_4 = arith.constant 0 : index
    %3 = vector.load %arg2[%c0_3, %c0_4] : memref<1x128xf32, #tpu.memory_space<vmem>>, vector<1x128xf32>
    %4 = vector.broadcast %3 : vector<1x128xf32> to vector<8x128xf32>
    %5 = arith.addf %2, %4 : vector<8x128xf32>
    %c0_5 = arith.constant 0 : index
    %c0_6 = arith.constant 0 : index
    %6 = vector.load %arg3[%c0_5, %c0_6] : memref<128x128xbf16, #tpu.memory_space<vmem>>, vector<128x128xbf16>
    %c0_7 = arith.constant 0 : index
    %c0_8 = arith.constant 0 : index
    %7 = vector.load %arg4[%c0_7, %c0_8] : memref<1x128xf32, #tpu.memory_space<vmem>>, vector<1x128xf32>
    %c0_9 = arith.constant 0 : index
    %c0_10 = arith.constant 0 : index
    %8 = vector.load %arg5[%c0_9, %c0_10] : memref<128x10xbf16, #tpu.memory_space<vmem>>, vector<128x10xbf16>
    %c0_11 = arith.constant 0 : index
    %c0_12 = arith.constant 0 : index
    %9 = vector.load %arg6[%c0_11, %c0_12] : memref<1x10xf32, #tpu.memory_space<vmem>>, vector<1x10xf32>
    %10 = tpu.iota {dimensions = array<i32: 0>} : vector<8x128xi32>
    %c128_i32 = arith.constant 128 : i32
    %11 = vector.broadcast %c128_i32 : i32 to vector<8x128xi32>
    %12 = arith.muli %10, %11 : vector<8x128xi32>
    %13 = tpu.iota {dimensions = array<i32: 1>} : vector<8x128xi32>
    %14 = arith.addi %12, %13 : vector<8x128xi32>
    %cst_13 = arith.constant 0.000000e+00 : f32
    %15 = vector.broadcast %cst_13 : f32 to vector<8x128xf32>
    %cst_14 = arith.constant 0.000000e+00 : f32
    %16 = vector.broadcast %cst_14 : f32 to vector<8x10xf32>
    %cst_15 = arith.constant 0xFF800000 : f32
    %17 = vector.broadcast %cst_15 : f32 to vector<8x10xf32>
    %c0_i32 = arith.constant 0 : i32
    %c2_i32 = arith.constant 2 : i32
    %18 = arith.muli %c0_i32, %c2_i32 : i32
    %c1234_i32 = arith.constant 1234 : i32
    %19 = arith.addi %c1234_i32, %18 : i32
    %c1_i32 = arith.constant 1 : i32
    %20 = arith.addi %19, %c1_i32 : i32
    %cst_16 = arith.constant 0.818730771 : f32
    %21 = vector.broadcast %cst_16 : f32 to vector<8x128xf32>
    %22 = arith.mulf %21, %15 : vector<8x128xf32>
    %23 = arith.addf %22, %5 : vector<8x128xf32>
    %cst_17 = arith.constant 1.000000e+00 : f32
    %24 = vector.broadcast %cst_17 : f32 to vector<8x128xf32>
    %25 = arith.subf %23, %24 : vector<8x128xf32>
    %26 = arith.negf %25 : vector<8x128xf32>
    %27 = math.exp %26 : vector<8x128xf32>
    %cst_18 = arith.constant 1.000000e+00 : f32
    %28 = vector.broadcast %cst_18 : f32 to vector<8x128xf32>
    %29 = arith.addf %28, %27 : vector<8x128xf32>
    %30 = arith.divf %28, %29 : vector<8x128xf32>
    %c-1640531527_i32 = arith.constant -1640531527 : i32
    %31 = arith.muli %19, %c-1640531527_i32 : i32
    %32 = vector.broadcast %31 : i32 to vector<8x128xi32>
    %33 = arith.xori %14, %32 : vector<8x128xi32>
    %c16_i32 = arith.constant 16 : i32
    %34 = vector.broadcast %c16_i32 : i32 to vector<8x128xi32>
    %35 = arith.shrui %33, %34 : vector<8x128xi32>
    %36 = arith.xori %33, %35 : vector<8x128xi32>
    %c2146121005_i32 = arith.constant 2146121005 : i32
    %37 = vector.broadcast %c2146121005_i32 : i32 to vector<8x128xi32>
    %38 = arith.muli %36, %37 : vector<8x128xi32>
    %c15_i32 = arith.constant 15 : i32
    %39 = vector.broadcast %c15_i32 : i32 to vector<8x128xi32>
    %40 = arith.shrui %38, %39 : vector<8x128xi32>
    %41 = arith.xori %38, %40 : vector<8x128xi32>
    %c-2073254261_i32 = arith.constant -2073254261 : i32
    %42 = vector.broadcast %c-2073254261_i32 : i32 to vector<8x128xi32>
    %43 = arith.muli %41, %42 : vector<8x128xi32>
    %c16_i32_19 = arith.constant 16 : i32
    %44 = vector.broadcast %c16_i32_19 : i32 to vector<8x128xi32>
    %45 = arith.shrui %43, %44 : vector<8x128xi32>
    %46 = arith.xori %43, %45 : vector<8x128xi32>
    %c8_i32 = arith.constant 8 : i32
    %47 = vector.broadcast %c8_i32 : i32 to vector<8x128xi32>
    %48 = arith.shrui %46, %47 : vector<8x128xi32>
    %49 = arith.uitofp %48 : vector<8x128xi32> to vector<8x128xf32>
    %cst_20 = arith.constant 0x4B800000 : f32
    %50 = vector.broadcast %cst_20 : f32 to vector<8x128xf32>
    %51 = arith.mulf %30, %50 : vector<8x128xf32>
    %52 = arith.cmpf olt, %49, %51 : vector<8x128xf32>
    %53 = arith.extui %52 : vector<8x128xi1> to vector<8x128xi32>
    %54 = arith.sitofp %53 : vector<8x128xi32> to vector<8x128xf32>
    %cst_21 = arith.constant 1.000000e+00 : f32
    %55 = vector.broadcast %cst_21 : f32 to vector<8x128xf32>
    %56 = arith.subf %55, %54 : vector<8x128xf32>
    %57 = arith.mulf %23, %56 : vector<8x128xf32>
    %58 = arith.truncf %54 : vector<8x128xf32> to vector<8x128xbf16>
    %cst_22 = arith.constant dense<0.000000e+00> : vector<8x128xf32>
    %59 = tpu.matmul %58, %6, %cst_22 {dimension_numbers = #tpu.dot_dimension_numbers<[1], [0], [0], [1], [0, 0, 1, 1], [], []>} : vector<8x128xbf16>, vector<128x128xbf16>, vector<8x128xf32> -> vector<8x128xf32>
    %60 = vector.broadcast %7 : vector<1x128xf32> to vector<8x128xf32>
    %61 = arith.addf %59, %60 : vector<8x128xf32>
    %cst_23 = arith.constant 0.818730771 : f32
    %62 = vector.broadcast %cst_23 : f32 to vector<8x128xf32>
    %63 = arith.mulf %62, %15 : vector<8x128xf32>
    %64 = arith.addf %63, %61 : vector<8x128xf32>
    %cst_24 = arith.constant 1.000000e+00 : f32
    %65 = vector.broadcast %cst_24 : f32 to vector<8x128xf32>
    %66 = arith.subf %64, %65 : vector<8x128xf32>
    %67 = arith.negf %66 : vector<8x128xf32>
    %68 = math.exp %67 : vector<8x128xf32>
    %cst_25 = arith.constant 1.000000e+00 : f32
    %69 = vector.broadcast %cst_25 : f32 to vector<8x128xf32>
    %70 = arith.addf %69, %68 : vector<8x128xf32>
    %71 = arith.divf %69, %70 : vector<8x128xf32>
    %c-1640531527_i32_26 = arith.constant -1640531527 : i32
    %72 = arith.muli %20, %c-1640531527_i32_26 : i32
    %73 = vector.broadcast %72 : i32 to vector<8x128xi32>
    %74 = arith.xori %14, %73 : vector<8x128xi32>
    %c16_i32_27 = arith.constant 16 : i32
    %75 = vector.broadcast %c16_i32_27 : i32 to vector<8x128xi32>
    %76 = arith.shrui %74, %75 : vector<8x128xi32>
    %77 = arith.xori %74, %76 : vector<8x128xi32>
    %c2146121005_i32_28 = arith.constant 2146121005 : i32
    %78 = vector.broadcast %c2146121005_i32_28 : i32 to vector<8x128xi32>
    %79 = arith.muli %77, %78 : vector<8x128xi32>
    %c15_i32_29 = arith.constant 15 : i32
    %80 = vector.broadcast %c15_i32_29 : i32 to vector<8x128xi32>
    %81 = arith.shrui %79, %80 : vector<8x128xi32>
    %82 = arith.xori %79, %81 : vector<8x128xi32>
    %c-2073254261_i32_30 = arith.constant -2073254261 : i32
    %83 = vector.broadcast %c-2073254261_i32_30 : i32 to vector<8x128xi32>
    %84 = arith.muli %82, %83 : vector<8x128xi32>
    %c16_i32_31 = arith.constant 16 : i32
    %85 = vector.broadcast %c16_i32_31 : i32 to vector<8x128xi32>
    %86 = arith.shrui %84, %85 : vector<8x128xi32>
    %87 = arith.xori %84, %86 : vector<8x128xi32>
    %c8_i32_32 = arith.constant 8 : i32
    %88 = vector.broadcast %c8_i32_32 : i32 to vector<8x128xi32>
    %89 = arith.shrui %87, %88 : vector<8x128xi32>
    %90 = arith.uitofp %89 : vector<8x128xi32> to vector<8x128xf32>
    %cst_33 = arith.constant 0x4B800000 : f32
    %91 = vector.broadcast %cst_33 : f32 to vector<8x128xf32>
    %92 = arith.mulf %71, %91 : vector<8x128xf32>
    %93 = arith.cmpf olt, %90, %92 : vector<8x128xf32>
    %94 = arith.extui %93 : vector<8x128xi1> to vector<8x128xi32>
    %95 = arith.sitofp %94 : vector<8x128xi32> to vector<8x128xf32>
    %cst_34 = arith.constant 1.000000e+00 : f32
    %96 = vector.broadcast %cst_34 : f32 to vector<8x128xf32>
    %97 = arith.subf %96, %95 : vector<8x128xf32>
    %98 = arith.mulf %64, %97 : vector<8x128xf32>
    %99 = arith.truncf %95 : vector<8x128xf32> to vector<8x128xbf16>
    %cst_35 = arith.constant dense<0.000000e+00> : vector<8x10xf32>
    %100 = tpu.matmul %99, %8, %cst_35 {dimension_numbers = #tpu.dot_dimension_numbers<[1], [0], [0], [1], [0, 0, 1, 1], [], []>} : vector<8x128xbf16>, vector<128x10xbf16>, vector<8x10xf32> -> vector<8x10xf32>
    %101 = vector.broadcast %9 : vector<1x10xf32> to vector<8x10xf32>
    %102 = arith.addf %100, %101 : vector<8x10xf32>
    %103 = arith.subf %102, %16 : vector<8x10xf32>
    %cst_36 = arith.constant 2.000000e-01 : f32
    %104 = vector.broadcast %cst_36 : f32 to vector<8x10xf32>
    %105 = arith.mulf %104, %103 : vector<8x10xf32>
    %106 = arith.addf %16, %105 : vector<8x10xf32>
    %107 = arith.subf %106, %16 : vector<8x10xf32>
    %cst_37 = arith.constant 1.000000e-01 : f32
    %108 = vector.broadcast %cst_37 : f32 to vector<8x10xf32>
    %109 = arith.mulf %108, %107 : vector<8x10xf32>
    %110 = arith.addf %16, %109 : vector<8x10xf32>
    %111 = arith.maximumf %17, %110 : vector<8x10xf32>
    %c1_i32_38 = arith.constant 1 : i32
    %c2_i32_39 = arith.constant 2 : i32
    %112 = arith.muli %c1_i32_38, %c2_i32_39 : i32
    %c1234_i32_40 = arith.constant 1234 : i32
    %113 = arith.addi %c1234_i32_40, %112 : i32
    %c1_i32_41 = arith.constant 1 : i32
    %114 = arith.addi %113, %c1_i32_41 : i32
    %cst_42 = arith.constant 0.818730771 : f32
    %115 = vector.broadcast %cst_42 : f32 to vector<8x128xf32>
    %116 = arith.mulf %115, %57 : vector<8x128xf32>
    %117 = arith.addf %116, %5 : vector<8x128xf32>
    %cst_43 = arith.constant 1.000000e+00 : f32
    %118 = vector.broadcast %cst_43 : f32 to vector<8x128xf32>
    %119 = arith.subf %117, %118 : vector<8x128xf32>
    %120 = arith.negf %119 : vector<8x128xf32>
    %121 = math.exp %120 : vector<8x128xf32>
    %cst_44 = arith.constant 1.000000e+00 : f32
    %122 = vector.broadcast %cst_44 : f32 to vector<8x128xf32>
    %123 = arith.addf %122, %121 : vector<8x128xf32>
    %124 = arith.divf %122, %123 : vector<8x128xf32>
    %c-1640531527_i32_45 = arith.constant -1640531527 : i32
    %125 = arith.muli %113, %c-1640531527_i32_45 : i32
    %126 = vector.broadcast %125 : i32 to vector<8x128xi32>
    %127 = arith.xori %14, %126 : vector<8x128xi32>
    %c16_i32_46 = arith.constant 16 : i32
    %128 = vector.broadcast %c16_i32_46 : i32 to vector<8x128xi32>
    %129 = arith.shrui %127, %128 : vector<8x128xi32>
    %130 = arith.xori %127, %129 : vector<8x128xi32>
    %c2146121005_i32_47 = arith.constant 2146121005 : i32
    %131 = vector.broadcast %c2146121005_i32_47 : i32 to vector<8x128xi32>
    %132 = arith.muli %130, %131 : vector<8x128xi32>
    %c15_i32_48 = arith.constant 15 : i32
    %133 = vector.broadcast %c15_i32_48 : i32 to vector<8x128xi32>
    %134 = arith.shrui %132, %133 : vector<8x128xi32>
    %135 = arith.xori %132, %134 : vector<8x128xi32>
    %c-2073254261_i32_49 = arith.constant -2073254261 : i32
    %136 = vector.broadcast %c-2073254261_i32_49 : i32 to vector<8x128xi32>
    %137 = arith.muli %135, %136 : vector<8x128xi32>
    %c16_i32_50 = arith.constant 16 : i32
    %138 = vector.broadcast %c16_i32_50 : i32 to vector<8x128xi32>
    %139 = arith.shrui %137, %138 : vector<8x128xi32>
    %140 = arith.xori %137, %139 : vector<8x128xi32>
    %c8_i32_51 = arith.constant 8 : i32
    %141 = vector.broadcast %c8_i32_51 : i32 to vector<8x128xi32>
    %142 = arith.shrui %140, %141 : vector<8x128xi32>
    %143 = arith.uitofp %142 : vector<8x128xi32> to vector<8x128xf32>
    %cst_52 = arith.constant 0x4B800000 : f32
    %144 = vector.broadcast %cst_52 : f32 to vector<8x128xf32>
    %145 = arith.mulf %124, %144 : vector<8x128xf32>
    %146 = arith.cmpf olt, %143, %145 : vector<8x128xf32>
    %147 = arith.extui %146 : vector<8x128xi1> to vector<8x128xi32>
    %148 = arith.sitofp %147 : vector<8x128xi32> to vector<8x128xf32>
    %cst_53 = arith.constant 1.000000e+00 : f32
    %149 = vector.broadcast %cst_53 : f32 to vector<8x128xf32>
    %150 = arith.subf %149, %148 : vector<8x128xf32>
    %151 = arith.mulf %117, %150 : vector<8x128xf32>
    %152 = arith.truncf %148 : vector<8x128xf32> to vector<8x128xbf16>
    %cst_54 = arith.constant dense<0.000000e+00> : vector<8x128xf32>
    %153 = tpu.matmul %152, %6, %cst_54 {dimension_numbers = #tpu.dot_dimension_numbers<[1], [0], [0], [1], [0, 0, 1, 1], [], []>} : vector<8x128xbf16>, vector<128x128xbf16>, vector<8x128xf32> -> vector<8x128xf32>
    %154 = vector.broadcast %7 : vector<1x128xf32> to vector<8x128xf32>
    %155 = arith.addf %153, %154 : vector<8x128xf32>
    %cst_55 = arith.constant 0.818730771 : f32
    %156 = vector.broadcast %cst_55 : f32 to vector<8x128xf32>
    %157 = arith.mulf %156, %98 : vector<8x128xf32>
    %158 = arith.addf %157, %155 : vector<8x128xf32>
    %cst_56 = arith.constant 1.000000e+00 : f32
    %159 = vector.broadcast %cst_56 : f32 to vector<8x128xf32>
    %160 = arith.subf %158, %159 : vector<8x128xf32>
    %161 = arith.negf %160 : vector<8x128xf32>
    %162 = math.exp %161 : vector<8x128xf32>
    %cst_57 = arith.constant 1.000000e+00 : f32
    %163 = vector.broadcast %cst_57 : f32 to vector<8x128xf32>
    %164 = arith.addf %163, %162 : vector<8x128xf32>
    %165 = arith.divf %163, %164 : vector<8x128xf32>
    %c-1640531527_i32_58 = arith.constant -1640531527 : i32
    %166 = arith.muli %114, %c-1640531527_i32_58 : i32
    %167 = vector.broadcast %166 : i32 to vector<8x128xi32>
    %168 = arith.xori %14, %167 : vector<8x128xi32>
    %c16_i32_59 = arith.constant 16 : i32
    %169 = vector.broadcast %c16_i32_59 : i32 to vector<8x128xi32>
    %170 = arith.shrui %168, %169 : vector<8x128xi32>
    %171 = arith.xori %168, %170 : vector<8x128xi32>
    %c2146121005_i32_60 = arith.constant 2146121005 : i32
    %172 = vector.broadcast %c2146121005_i32_60 : i32 to vector<8x128xi32>
    %173 = arith.muli %171, %172 : vector<8x128xi32>
    %c15_i32_61 = arith.constant 15 : i32
    %174 = vector.broadcast %c15_i32_61 : i32 to vector<8x128xi32>
    %175 = arith.shrui %173, %174 : vector<8x128xi32>
    %176 = arith.xori %173, %175 : vector<8x128xi32>
    %c-2073254261_i32_62 = arith.constant -2073254261 : i32
    %177 = vector.broadcast %c-2073254261_i32_62 : i32 to vector<8x128xi32>
    %178 = arith.muli %176, %177 : vector<8x128xi32>
    %c16_i32_63 = arith.constant 16 : i32
    %179 = vector.broadcast %c16_i32_63 : i32 to vector<8x128xi32>
    %180 = arith.shrui %178, %179 : vector<8x128xi32>
    %181 = arith.xori %178, %180 : vector<8x128xi32>
    %c8_i32_64 = arith.constant 8 : i32
    %182 = vector.broadcast %c8_i32_64 : i32 to vector<8x128xi32>
    %183 = arith.shrui %181, %182 : vector<8x128xi32>
    %184 = arith.uitofp %183 : vector<8x128xi32> to vector<8x128xf32>
    %cst_65 = arith.constant 0x4B800000 : f32
    %185 = vector.broadcast %cst_65 : f32 to vector<8x128xf32>
    %186 = arith.mulf %165, %185 : vector<8x128xf32>
    %187 = arith.cmpf olt, %184, %186 : vector<8x128xf32>
    %188 = arith.extui %187 : vector<8x128xi1> to vector<8x128xi32>
    %189 = arith.sitofp %188 : vector<8x128xi32> to vector<8x128xf32>
    %cst_66 = arith.constant 1.000000e+00 : f32
    %190 = vector.broadcast %cst_66 : f32 to vector<8x128xf32>
    %191 = arith.subf %190, %189 : vector<8x128xf32>
    %192 = arith.mulf %158, %191 : vector<8x128xf32>
    %193 = arith.truncf %189 : vector<8x128xf32> to vector<8x128xbf16>
    %cst_67 = arith.constant dense<0.000000e+00> : vector<8x10xf32>
    %194 = tpu.matmul %193, %8, %cst_67 {dimension_numbers = #tpu.dot_dimension_numbers<[1], [0], [0], [1], [0, 0, 1, 1], [], []>} : vector<8x128xbf16>, vector<128x10xbf16>, vector<8x10xf32> -> vector<8x10xf32>
    %195 = vector.broadcast %9 : vector<1x10xf32> to vector<8x10xf32>
    %196 = arith.addf %194, %195 : vector<8x10xf32>
    %197 = arith.subf %196, %106 : vector<8x10xf32>
    %cst_68 = arith.constant 2.000000e-01 : f32
    %198 = vector.broadcast %cst_68 : f32 to vector<8x10xf32>
    %199 = arith.mulf %198, %197 : vector<8x10xf32>
    %200 = arith.addf %106, %199 : vector<8x10xf32>
    %201 = arith.subf %200, %110 : vector<8x10xf32>
    %cst_69 = arith.constant 1.000000e-01 : f32
    %202 = vector.broadcast %cst_69 : f32 to vector<8x10xf32>
    %203 = arith.mulf %202, %201 : vector<8x10xf32>
    %204 = arith.addf %110, %203 : vector<8x10xf32>
    %205 = arith.maximumf %111, %204 : vector<8x10xf32>
    %c2_i32_70 = arith.constant 2 : i32
    %c2_i32_71 = arith.constant 2 : i32
    %206 = arith.muli %c2_i32_70, %c2_i32_71 : i32
    %c1234_i32_72 = arith.constant 1234 : i32
    %207 = arith.addi %c1234_i32_72, %206 : i32
    %c1_i32_73 = arith.constant 1 : i32
    %208 = arith.addi %207, %c1_i32_73 : i32
    %cst_74 = arith.constant 0.818730771 : f32
    %209 = vector.broadcast %cst_74 : f32 to vector<8x128xf32>
    %210 = arith.mulf %209, %151 : vector<8x128xf32>
    %211 = arith.addf %210, %5 : vector<8x128xf32>
    %cst_75 = arith.constant 1.000000e+00 : f32
    %212 = vector.broadcast %cst_75 : f32 to vector<8x128xf32>
    %213 = arith.subf %211, %212 : vector<8x128xf32>
    %214 = arith.negf %213 : vector<8x128xf32>
    %215 = math.exp %214 : vector<8x128xf32>
    %cst_76 = arith.constant 1.000000e+00 : f32
    %216 = vector.broadcast %cst_76 : f32 to vector<8x128xf32>
    %217 = arith.addf %216, %215 : vector<8x128xf32>
    %218 = arith.divf %216, %217 : vector<8x128xf32>
    %c-1640531527_i32_77 = arith.constant -1640531527 : i32
    %219 = arith.muli %207, %c-1640531527_i32_77 : i32
    %220 = vector.broadcast %219 : i32 to vector<8x128xi32>
    %221 = arith.xori %14, %220 : vector<8x128xi32>
    %c16_i32_78 = arith.constant 16 : i32
    %222 = vector.broadcast %c16_i32_78 : i32 to vector<8x128xi32>
    %223 = arith.shrui %221, %222 : vector<8x128xi32>
    %224 = arith.xori %221, %223 : vector<8x128xi32>
    %c2146121005_i32_79 = arith.constant 2146121005 : i32
    %225 = vector.broadcast %c2146121005_i32_79 : i32 to vector<8x128xi32>
    %226 = arith.muli %224, %225 : vector<8x128xi32>
    %c15_i32_80 = arith.constant 15 : i32
    %227 = vector.broadcast %c15_i32_80 : i32 to vector<8x128xi32>
    %228 = arith.shrui %226, %227 : vector<8x128xi32>
    %229 = arith.xori %226, %228 : vector<8x128xi32>
    %c-2073254261_i32_81 = arith.constant -2073254261 : i32
    %230 = vector.broadcast %c-2073254261_i32_81 : i32 to vector<8x128xi32>
    %231 = arith.muli %229, %230 : vector<8x128xi32>
    %c16_i32_82 = arith.constant 16 : i32
    %232 = vector.broadcast %c16_i32_82 : i32 to vector<8x128xi32>
    %233 = arith.shrui %231, %232 : vector<8x128xi32>
    %234 = arith.xori %231, %233 : vector<8x128xi32>
    %c8_i32_83 = arith.constant 8 : i32
    %235 = vector.broadcast %c8_i32_83 : i32 to vector<8x128xi32>
    %236 = arith.shrui %234, %235 : vector<8x128xi32>
    %237 = arith.uitofp %236 : vector<8x128xi32> to vector<8x128xf32>
    %cst_84 = arith.constant 0x4B800000 : f32
    %238 = vector.broadcast %cst_84 : f32 to vector<8x128xf32>
    %239 = arith.mulf %218, %238 : vector<8x128xf32>
    %240 = arith.cmpf olt, %237, %239 : vector<8x128xf32>
    %241 = arith.extui %240 : vector<8x128xi1> to vector<8x128xi32>
    %242 = arith.sitofp %241 : vector<8x128xi32> to vector<8x128xf32>
    %cst_85 = arith.constant 1.000000e+00 : f32
    %243 = vector.broadcast %cst_85 : f32 to vector<8x128xf32>
    %244 = arith.subf %243, %242 : vector<8x128xf32>
    %245 = arith.mulf %211, %244 : vector<8x128xf32>
    %246 = arith.truncf %242 : vector<8x128xf32> to vector<8x128xbf16>
    %cst_86 = arith.constant dense<0.000000e+00> : vector<8x128xf32>
    %247 = tpu.matmul %246, %6, %cst_86 {dimension_numbers = #tpu.dot_dimension_numbers<[1], [0], [0], [1], [0, 0, 1, 1], [], []>} : vector<8x128xbf16>, vector<128x128xbf16>, vector<8x128xf32> -> vector<8x128xf32>
    %248 = vector.broadcast %7 : vector<1x128xf32> to vector<8x128xf32>
    %249 = arith.addf %247, %248 : vector<8x128xf32>
    %cst_87 = arith.constant 0.818730771 : f32
    %250 = vector.broadcast %cst_87 : f32 to vector<8x128xf32>
    %251 = arith.mulf %250, %192 : vector<8x128xf32>
    %252 = arith.addf %251, %249 : vector<8x128xf32>
    %cst_88 = arith.constant 1.000000e+00 : f32
    %253 = vector.broadcast %cst_88 : f32 to vector<8x128xf32>
    %254 = arith.subf %252, %253 : vector<8x128xf32>
    %255 = arith.negf %254 : vector<8x128xf32>
    %256 = math.exp %255 : vector<8x128xf32>
    %cst_89 = arith.constant 1.000000e+00 : f32
    %257 = vector.broadcast %cst_89 : f32 to vector<8x128xf32>
    %258 = arith.addf %257, %256 : vector<8x128xf32>
    %259 = arith.divf %257, %258 : vector<8x128xf32>
    %c-1640531527_i32_90 = arith.constant -1640531527 : i32
    %260 = arith.muli %208, %c-1640531527_i32_90 : i32
    %261 = vector.broadcast %260 : i32 to vector<8x128xi32>
    %262 = arith.xori %14, %261 : vector<8x128xi32>
    %c16_i32_91 = arith.constant 16 : i32
    %263 = vector.broadcast %c16_i32_91 : i32 to vector<8x128xi32>
    %264 = arith.shrui %262, %263 : vector<8x128xi32>
    %265 = arith.xori %262, %264 : vector<8x128xi32>
    %c2146121005_i32_92 = arith.constant 2146121005 : i32
    %266 = vector.broadcast %c2146121005_i32_92 : i32 to vector<8x128xi32>
    %267 = arith.muli %265, %266 : vector<8x128xi32>
    %c15_i32_93 = arith.constant 15 : i32
    %268 = vector.broadcast %c15_i32_93 : i32 to vector<8x128xi32>
    %269 = arith.shrui %267, %268 : vector<8x128xi32>
    %270 = arith.xori %267, %269 : vector<8x128xi32>
    %c-2073254261_i32_94 = arith.constant -2073254261 : i32
    %271 = vector.broadcast %c-2073254261_i32_94 : i32 to vector<8x128xi32>
    %272 = arith.muli %270, %271 : vector<8x128xi32>
    %c16_i32_95 = arith.constant 16 : i32
    %273 = vector.broadcast %c16_i32_95 : i32 to vector<8x128xi32>
    %274 = arith.shrui %272, %273 : vector<8x128xi32>
    %275 = arith.xori %272, %274 : vector<8x128xi32>
    %c8_i32_96 = arith.constant 8 : i32
    %276 = vector.broadcast %c8_i32_96 : i32 to vector<8x128xi32>
    %277 = arith.shrui %275, %276 : vector<8x128xi32>
    %278 = arith.uitofp %277 : vector<8x128xi32> to vector<8x128xf32>
    %cst_97 = arith.constant 0x4B800000 : f32
    %279 = vector.broadcast %cst_97 : f32 to vector<8x128xf32>
    %280 = arith.mulf %259, %279 : vector<8x128xf32>
    %281 = arith.cmpf olt, %278, %280 : vector<8x128xf32>
    %282 = arith.extui %281 : vector<8x128xi1> to vector<8x128xi32>
    %283 = arith.sitofp %282 : vector<8x128xi32> to vector<8x128xf32>
    %cst_98 = arith.constant 1.000000e+00 : f32
    %284 = vector.broadcast %cst_98 : f32 to vector<8x128xf32>
    %285 = arith.subf %284, %283 : vector<8x128xf32>
    %286 = arith.mulf %252, %285 : vector<8x128xf32>
    %287 = arith.truncf %283 : vector<8x128xf32> to vector<8x128xbf16>
    %cst_99 = arith.constant dense<0.000000e+00> : vector<8x10xf32>
    %288 = tpu.matmul %287, %8, %cst_99 {dimension_numbers = #tpu.dot_dimension_numbers<[1], [0], [0], [1], [0, 0, 1, 1], [], []>} : vector<8x128xbf16>, vector<128x10xbf16>, vector<8x10xf32> -> vector<8x10xf32>
    %289 = vector.broadcast %9 : vector<1x10xf32> to vector<8x10xf32>
    %290 = arith.addf %288, %289 : vector<8x10xf32>
    %291 = arith.subf %290, %200 : vector<8x10xf32>
    %cst_100 = arith.constant 2.000000e-01 : f32
    %292 = vector.broadcast %cst_100 : f32 to vector<8x10xf32>
    %293 = arith.mulf %292, %291 : vector<8x10xf32>
    %294 = arith.addf %200, %293 : vector<8x10xf32>
    %295 = arith.subf %294, %204 : vector<8x10xf32>
    %cst_101 = arith.constant 1.000000e-01 : f32
    %296 = vector.broadcast %cst_101 : f32 to vector<8x10xf32>
    %297 = arith.mulf %296, %295 : vector<8x10xf32>
    %298 = arith.addf %204, %297 : vector<8x10xf32>
    %299 = arith.maximumf %205, %298 : vector<8x10xf32>
    %c3_i32 = arith.constant 3 : i32
    %c2_i32_102 = arith.constant 2 : i32
    %300 = arith.muli %c3_i32, %c2_i32_102 : i32
    %c1234_i32_103 = arith.constant 1234 : i32
    %301 = arith.addi %c1234_i32_103, %300 : i32
    %c1_i32_104 = arith.constant 1 : i32
    %302 = arith.addi %301, %c1_i32_104 : i32
    %cst_105 = arith.constant 0.818730771 : f32
    %303 = vector.broadcast %cst_105 : f32 to vector<8x128xf32>
    %304 = arith.mulf %303, %245 : vector<8x128xf32>
    %305 = arith.addf %304, %5 : vector<8x128xf32>
    %cst_106 = arith.constant 1.000000e+00 : f32
    %306 = vector.broadcast %cst_106 : f32 to vector<8x128xf32>
    %307 = arith.subf %305, %306 : vector<8x128xf32>
    %308 = arith.negf %307 : vector<8x128xf32>
    %309 = math.exp %308 : vector<8x128xf32>
    %cst_107 = arith.constant 1.000000e+00 : f32
    %310 = vector.broadcast %cst_107 : f32 to vector<8x128xf32>
    %311 = arith.addf %310, %309 : vector<8x128xf32>
    %312 = arith.divf %310, %311 : vector<8x128xf32>
    %c-1640531527_i32_108 = arith.constant -1640531527 : i32
    %313 = arith.muli %301, %c-1640531527_i32_108 : i32
    %314 = vector.broadcast %313 : i32 to vector<8x128xi32>
    %315 = arith.xori %14, %314 : vector<8x128xi32>
    %c16_i32_109 = arith.constant 16 : i32
    %316 = vector.broadcast %c16_i32_109 : i32 to vector<8x128xi32>
    %317 = arith.shrui %315, %316 : vector<8x128xi32>
    %318 = arith.xori %315, %317 : vector<8x128xi32>
    %c2146121005_i32_110 = arith.constant 2146121005 : i32
    %319 = vector.broadcast %c2146121005_i32_110 : i32 to vector<8x128xi32>
    %320 = arith.muli %318, %319 : vector<8x128xi32>
    %c15_i32_111 = arith.constant 15 : i32
    %321 = vector.broadcast %c15_i32_111 : i32 to vector<8x128xi32>
    %322 = arith.shrui %320, %321 : vector<8x128xi32>
    %323 = arith.xori %320, %322 : vector<8x128xi32>
    %c-2073254261_i32_112 = arith.constant -2073254261 : i32
    %324 = vector.broadcast %c-2073254261_i32_112 : i32 to vector<8x128xi32>
    %325 = arith.muli %323, %324 : vector<8x128xi32>
    %c16_i32_113 = arith.constant 16 : i32
    %326 = vector.broadcast %c16_i32_113 : i32 to vector<8x128xi32>
    %327 = arith.shrui %325, %326 : vector<8x128xi32>
    %328 = arith.xori %325, %327 : vector<8x128xi32>
    %c8_i32_114 = arith.constant 8 : i32
    %329 = vector.broadcast %c8_i32_114 : i32 to vector<8x128xi32>
    %330 = arith.shrui %328, %329 : vector<8x128xi32>
    %331 = arith.uitofp %330 : vector<8x128xi32> to vector<8x128xf32>
    %cst_115 = arith.constant 0x4B800000 : f32
    %332 = vector.broadcast %cst_115 : f32 to vector<8x128xf32>
    %333 = arith.mulf %312, %332 : vector<8x128xf32>
    %334 = arith.cmpf olt, %331, %333 : vector<8x128xf32>
    %335 = arith.extui %334 : vector<8x128xi1> to vector<8x128xi32>
    %336 = arith.sitofp %335 : vector<8x128xi32> to vector<8x128xf32>
    %cst_116 = arith.constant 1.000000e+00 : f32
    %337 = vector.broadcast %cst_116 : f32 to vector<8x128xf32>
    %338 = arith.subf %337, %336 : vector<8x128xf32>
    %339 = arith.mulf %305, %338 : vector<8x128xf32>
    %340 = arith.truncf %336 : vector<8x128xf32> to vector<8x128xbf16>
    %cst_117 = arith.constant dense<0.000000e+00> : vector<8x128xf32>
    %341 = tpu.matmul %340, %6, %cst_117 {dimension_numbers = #tpu.dot_dimension_numbers<[1], [0], [0], [1], [0, 0, 1, 1], [], []>} : vector<8x128xbf16>, vector<128x128xbf16>, vector<8x128xf32> -> vector<8x128xf32>
    %342 = vector.broadcast %7 : vector<1x128xf32> to vector<8x128xf32>
    %343 = arith.addf %341, %342 : vector<8x128xf32>
    %cst_118 = arith.constant 0.818730771 : f32
    %344 = vector.broadcast %cst_118 : f32 to vector<8x128xf32>
    %345 = arith.mulf %344, %286 : vector<8x128xf32>
    %346 = arith.addf %345, %343 : vector<8x128xf32>
    %cst_119 = arith.constant 1.000000e+00 : f32
    %347 = vector.broadcast %cst_119 : f32 to vector<8x128xf32>
    %348 = arith.subf %346, %347 : vector<8x128xf32>
    %349 = arith.negf %348 : vector<8x128xf32>
    %350 = math.exp %349 : vector<8x128xf32>
    %cst_120 = arith.constant 1.000000e+00 : f32
    %351 = vector.broadcast %cst_120 : f32 to vector<8x128xf32>
    %352 = arith.addf %351, %350 : vector<8x128xf32>
    %353 = arith.divf %351, %352 : vector<8x128xf32>
    %c-1640531527_i32_121 = arith.constant -1640531527 : i32
    %354 = arith.muli %302, %c-1640531527_i32_121 : i32
    %355 = vector.broadcast %354 : i32 to vector<8x128xi32>
    %356 = arith.xori %14, %355 : vector<8x128xi32>
    %c16_i32_122 = arith.constant 16 : i32
    %357 = vector.broadcast %c16_i32_122 : i32 to vector<8x128xi32>
    %358 = arith.shrui %356, %357 : vector<8x128xi32>
    %359 = arith.xori %356, %358 : vector<8x128xi32>
    %c2146121005_i32_123 = arith.constant 2146121005 : i32
    %360 = vector.broadcast %c2146121005_i32_123 : i32 to vector<8x128xi32>
    %361 = arith.muli %359, %360 : vector<8x128xi32>
    %c15_i32_124 = arith.constant 15 : i32
    %362 = vector.broadcast %c15_i32_124 : i32 to vector<8x128xi32>
    %363 = arith.shrui %361, %362 : vector<8x128xi32>
    %364 = arith.xori %361, %363 : vector<8x128xi32>
    %c-2073254261_i32_125 = arith.constant -2073254261 : i32
    %365 = vector.broadcast %c-2073254261_i32_125 : i32 to vector<8x128xi32>
    %366 = arith.muli %364, %365 : vector<8x128xi32>
    %c16_i32_126 = arith.constant 16 : i32
    %367 = vector.broadcast %c16_i32_126 : i32 to vector<8x128xi32>
    %368 = arith.shrui %366, %367 : vector<8x128xi32>
    %369 = arith.xori %366, %368 : vector<8x128xi32>
    %c8_i32_127 = arith.constant 8 : i32
    %370 = vector.broadcast %c8_i32_127 : i32 to vector<8x128xi32>
    %371 = arith.shrui %369, %370 : vector<8x128xi32>
    %372 = arith.uitofp %371 : vector<8x128xi32> to vector<8x128xf32>
    %cst_128 = arith.constant 0x4B800000 : f32
    %373 = vector.broadcast %cst_128 : f32 to vector<8x128xf32>
    %374 = arith.mulf %353, %373 : vector<8x128xf32>
    %375 = arith.cmpf olt, %372, %374 : vector<8x128xf32>
    %376 = arith.extui %375 : vector<8x128xi1> to vector<8x128xi32>
    %377 = arith.sitofp %376 : vector<8x128xi32> to vector<8x128xf32>
    %cst_129 = arith.constant 1.000000e+00 : f32
    %378 = vector.broadcast %cst_129 : f32 to vector<8x128xf32>
    %379 = arith.subf %378, %377 : vector<8x128xf32>
    %380 = arith.mulf %346, %379 : vector<8x128xf32>
    %381 = arith.truncf %377 : vector<8x128xf32> to vector<8x128xbf16>
    %cst_130 = arith.constant dense<0.000000e+00> : vector<8x10xf32>
    %382 = tpu.matmul %381, %8, %cst_130 {dimension_numbers = #tpu.dot_dimension_numbers<[1], [0], [0], [1], [0, 0, 1, 1], [], []>} : vector<8x128xbf16>, vector<128x10xbf16>, vector<8x10xf32> -> vector<8x10xf32>
    %383 = vector.broadcast %9 : vector<1x10xf32> to vector<8x10xf32>
    %384 = arith.addf %382, %383 : vector<8x10xf32>
    %385 = arith.subf %384, %294 : vector<8x10xf32>
    %cst_131 = arith.constant 2.000000e-01 : f32
    %386 = vector.broadcast %cst_131 : f32 to vector<8x10xf32>
    %387 = arith.mulf %386, %385 : vector<8x10xf32>
    %388 = arith.addf %294, %387 : vector<8x10xf32>
    %389 = arith.subf %388, %298 : vector<8x10xf32>
    %cst_132 = arith.constant 1.000000e-01 : f32
    %390 = vector.broadcast %cst_132 : f32 to vector<8x10xf32>
    %391 = arith.mulf %390, %389 : vector<8x10xf32>
    %392 = arith.addf %298, %391 : vector<8x10xf32>
    %393 = arith.maximumf %299, %392 : vector<8x10xf32>
    %c4_i32 = arith.constant 4 : i32
    %c2_i32_133 = arith.constant 2 : i32
    %394 = arith.muli %c4_i32, %c2_i32_133 : i32
    %c1234_i32_134 = arith.constant 1234 : i32
    %395 = arith.addi %c1234_i32_134, %394 : i32
    %c1_i32_135 = arith.constant 1 : i32
    %396 = arith.addi %395, %c1_i32_135 : i32
    %cst_136 = arith.constant 0.818730771 : f32
    %397 = vector.broadcast %cst_136 : f32 to vector<8x128xf32>
    %398 = arith.mulf %397, %339 : vector<8x128xf32>
    %399 = arith.addf %398, %5 : vector<8x128xf32>
    %cst_137 = arith.constant 1.000000e+00 : f32
    %400 = vector.broadcast %cst_137 : f32 to vector<8x128xf32>
    %401 = arith.subf %399, %400 : vector<8x128xf32>
    %402 = arith.negf %401 : vector<8x128xf32>
    %403 = math.exp %402 : vector<8x128xf32>
    %cst_138 = arith.constant 1.000000e+00 : f32
    %404 = vector.broadcast %cst_138 : f32 to vector<8x128xf32>
    %405 = arith.addf %404, %403 : vector<8x128xf32>
    %406 = arith.divf %404, %405 : vector<8x128xf32>
    %c-1640531527_i32_139 = arith.constant -1640531527 : i32
    %407 = arith.muli %395, %c-1640531527_i32_139 : i32
    %408 = vector.broadcast %407 : i32 to vector<8x128xi32>
    %409 = arith.xori %14, %408 : vector<8x128xi32>
    %c16_i32_140 = arith.constant 16 : i32
    %410 = vector.broadcast %c16_i32_140 : i32 to vector<8x128xi32>
    %411 = arith.shrui %409, %410 : vector<8x128xi32>
    %412 = arith.xori %409, %411 : vector<8x128xi32>
    %c2146121005_i32_141 = arith.constant 2146121005 : i32
    %413 = vector.broadcast %c2146121005_i32_141 : i32 to vector<8x128xi32>
    %414 = arith.muli %412, %413 : vector<8x128xi32>
    %c15_i32_142 = arith.constant 15 : i32
    %415 = vector.broadcast %c15_i32_142 : i32 to vector<8x128xi32>
    %416 = arith.shrui %414, %415 : vector<8x128xi32>
    %417 = arith.xori %414, %416 : vector<8x128xi32>
    %c-2073254261_i32_143 = arith.constant -2073254261 : i32
    %418 = vector.broadcast %c-2073254261_i32_143 : i32 to vector<8x128xi32>
    %419 = arith.muli %417, %418 : vector<8x128xi32>
    %c16_i32_144 = arith.constant 16 : i32
    %420 = vector.broadcast %c16_i32_144 : i32 to vector<8x128xi32>
    %421 = arith.shrui %419, %420 : vector<8x128xi32>
    %422 = arith.xori %419, %421 : vector<8x128xi32>
    %c8_i32_145 = arith.constant 8 : i32
    %423 = vector.broadcast %c8_i32_145 : i32 to vector<8x128xi32>
    %424 = arith.shrui %422, %423 : vector<8x128xi32>
    %425 = arith.uitofp %424 : vector<8x128xi32> to vector<8x128xf32>
    %cst_146 = arith.constant 0x4B800000 : f32
    %426 = vector.broadcast %cst_146 : f32 to vector<8x128xf32>
    %427 = arith.mulf %406, %426 : vector<8x128xf32>
    %428 = arith.cmpf olt, %425, %427 : vector<8x128xf32>
    %429 = arith.extui %428 : vector<8x128xi1> to vector<8x128xi32>
    %430 = arith.sitofp %429 : vector<8x128xi32> to vector<8x128xf32>
    %cst_147 = arith.constant 1.000000e+00 : f32
    %431 = vector.broadcast %cst_147 : f32 to vector<8x128xf32>
    %432 = arith.subf %431, %430 : vector<8x128xf32>
    %433 = arith.mulf %399, %432 : vector<8x128xf32>
    %434 = arith.truncf %430 : vector<8x128xf32> to vector<8x128xbf16>
    %cst_148 = arith.constant dense<0.000000e+00> : vector<8x128xf32>
    %435 = tpu.matmul %434, %6, %cst_148 {dimension_numbers = #tpu.dot_dimension_numbers<[1], [0], [0], [1], [0, 0, 1, 1], [], []>} : vector<8x128xbf16>, vector<128x128xbf16>, vector<8x128xf32> -> vector<8x128xf32>
    %436 = vector.broadcast %7 : vector<1x128xf32> to vector<8x128xf32>
    %437 = arith.addf %435, %436 : vector<8x128xf32>
    %cst_149 = arith.constant 0.818730771 : f32
    %438 = vector.broadcast %cst_149 : f32 to vector<8x128xf32>
    %439 = arith.mulf %438, %380 : vector<8x128xf32>
    %440 = arith.addf %439, %437 : vector<8x128xf32>
    %cst_150 = arith.constant 1.000000e+00 : f32
    %441 = vector.broadcast %cst_150 : f32 to vector<8x128xf32>
    %442 = arith.subf %440, %441 : vector<8x128xf32>
    %443 = arith.negf %442 : vector<8x128xf32>
    %444 = math.exp %443 : vector<8x128xf32>
    %cst_151 = arith.constant 1.000000e+00 : f32
    %445 = vector.broadcast %cst_151 : f32 to vector<8x128xf32>
    %446 = arith.addf %445, %444 : vector<8x128xf32>
    %447 = arith.divf %445, %446 : vector<8x128xf32>
    %c-1640531527_i32_152 = arith.constant -1640531527 : i32
    %448 = arith.muli %396, %c-1640531527_i32_152 : i32
    %449 = vector.broadcast %448 : i32 to vector<8x128xi32>
    %450 = arith.xori %14, %449 : vector<8x128xi32>
    %c16_i32_153 = arith.constant 16 : i32
    %451 = vector.broadcast %c16_i32_153 : i32 to vector<8x128xi32>
    %452 = arith.shrui %450, %451 : vector<8x128xi32>
    %453 = arith.xori %450, %452 : vector<8x128xi32>
    %c2146121005_i32_154 = arith.constant 2146121005 : i32
    %454 = vector.broadcast %c2146121005_i32_154 : i32 to vector<8x128xi32>
    %455 = arith.muli %453, %454 : vector<8x128xi32>
    %c15_i32_155 = arith.constant 15 : i32
    %456 = vector.broadcast %c15_i32_155 : i32 to vector<8x128xi32>
    %457 = arith.shrui %455, %456 : vector<8x128xi32>
    %458 = arith.xori %455, %457 : vector<8x128xi32>
    %c-2073254261_i32_156 = arith.constant -2073254261 : i32
    %459 = vector.broadcast %c-2073254261_i32_156 : i32 to vector<8x128xi32>
    %460 = arith.muli %458, %459 : vector<8x128xi32>
    %c16_i32_157 = arith.constant 16 : i32
    %461 = vector.broadcast %c16_i32_157 : i32 to vector<8x128xi32>
    %462 = arith.shrui %460, %461 : vector<8x128xi32>
    %463 = arith.xori %460, %462 : vector<8x128xi32>
    %c8_i32_158 = arith.constant 8 : i32
    %464 = vector.broadcast %c8_i32_158 : i32 to vector<8x128xi32>
    %465 = arith.shrui %463, %464 : vector<8x128xi32>
    %466 = arith.uitofp %465 : vector<8x128xi32> to vector<8x128xf32>
    %cst_159 = arith.constant 0x4B800000 : f32
    %467 = vector.broadcast %cst_159 : f32 to vector<8x128xf32>
    %468 = arith.mulf %447, %467 : vector<8x128xf32>
    %469 = arith.cmpf olt, %466, %468 : vector<8x128xf32>
    %470 = arith.extui %469 : vector<8x128xi1> to vector<8x128xi32>
    %471 = arith.sitofp %470 : vector<8x128xi32> to vector<8x128xf32>
    %cst_160 = arith.constant 1.000000e+00 : f32
    %472 = vector.broadcast %cst_160 : f32 to vector<8x128xf32>
    %473 = arith.subf %472, %471 : vector<8x128xf32>
    %474 = arith.mulf %440, %473 : vector<8x128xf32>
    %475 = arith.truncf %471 : vector<8x128xf32> to vector<8x128xbf16>
    %cst_161 = arith.constant dense<0.000000e+00> : vector<8x10xf32>
    %476 = tpu.matmul %475, %8, %cst_161 {dimension_numbers = #tpu.dot_dimension_numbers<[1], [0], [0], [1], [0, 0, 1, 1], [], []>} : vector<8x128xbf16>, vector<128x10xbf16>, vector<8x10xf32> -> vector<8x10xf32>
    %477 = vector.broadcast %9 : vector<1x10xf32> to vector<8x10xf32>
    %478 = arith.addf %476, %477 : vector<8x10xf32>
    %479 = arith.subf %478, %388 : vector<8x10xf32>
    %cst_162 = arith.constant 2.000000e-01 : f32
    %480 = vector.broadcast %cst_162 : f32 to vector<8x10xf32>
    %481 = arith.mulf %480, %479 : vector<8x10xf32>
    %482 = arith.addf %388, %481 : vector<8x10xf32>
    %483 = arith.subf %482, %392 : vector<8x10xf32>
    %cst_163 = arith.constant 1.000000e-01 : f32
    %484 = vector.broadcast %cst_163 : f32 to vector<8x10xf32>
    %485 = arith.mulf %484, %483 : vector<8x10xf32>
    %486 = arith.addf %392, %485 : vector<8x10xf32>
    %487 = arith.maximumf %393, %486 : vector<8x10xf32>
    %c5_i32 = arith.constant 5 : i32
    %c2_i32_164 = arith.constant 2 : i32
    %488 = arith.muli %c5_i32, %c2_i32_164 : i32
    %c1234_i32_165 = arith.constant 1234 : i32
    %489 = arith.addi %c1234_i32_165, %488 : i32
    %c1_i32_166 = arith.constant 1 : i32
    %490 = arith.addi %489, %c1_i32_166 : i32
    %cst_167 = arith.constant 0.818730771 : f32
    %491 = vector.broadcast %cst_167 : f32 to vector<8x128xf32>
    %492 = arith.mulf %491, %433 : vector<8x128xf32>
    %493 = arith.addf %492, %5 : vector<8x128xf32>
    %cst_168 = arith.constant 1.000000e+00 : f32
    %494 = vector.broadcast %cst_168 : f32 to vector<8x128xf32>
    %495 = arith.subf %493, %494 : vector<8x128xf32>
    %496 = arith.negf %495 : vector<8x128xf32>
    %497 = math.exp %496 : vector<8x128xf32>
    %cst_169 = arith.constant 1.000000e+00 : f32
    %498 = vector.broadcast %cst_169 : f32 to vector<8x128xf32>
    %499 = arith.addf %498, %497 : vector<8x128xf32>
    %500 = arith.divf %498, %499 : vector<8x128xf32>
    %c-1640531527_i32_170 = arith.constant -1640531527 : i32
    %501 = arith.muli %489, %c-1640531527_i32_170 : i32
    %502 = vector.broadcast %501 : i32 to vector<8x128xi32>
    %503 = arith.xori %14, %502 : vector<8x128xi32>
    %c16_i32_171 = arith.constant 16 : i32
    %504 = vector.broadcast %c16_i32_171 : i32 to vector<8x128xi32>
    %505 = arith.shrui %503, %504 : vector<8x128xi32>
    %506 = arith.xori %503, %505 : vector<8x128xi32>
    %c2146121005_i32_172 = arith.constant 2146121005 : i32
    %507 = vector.broadcast %c2146121005_i32_172 : i32 to vector<8x128xi32>
    %508 = arith.muli %506, %507 : vector<8x128xi32>
    %c15_i32_173 = arith.constant 15 : i32
    %509 = vector.broadcast %c15_i32_173 : i32 to vector<8x128xi32>
    %510 = arith.shrui %508, %509 : vector<8x128xi32>
    %511 = arith.xori %508, %510 : vector<8x128xi32>
    %c-2073254261_i32_174 = arith.constant -2073254261 : i32
    %512 = vector.broadcast %c-2073254261_i32_174 : i32 to vector<8x128xi32>
    %513 = arith.muli %511, %512 : vector<8x128xi32>
    %c16_i32_175 = arith.constant 16 : i32
    %514 = vector.broadcast %c16_i32_175 : i32 to vector<8x128xi32>
    %515 = arith.shrui %513, %514 : vector<8x128xi32>
    %516 = arith.xori %513, %515 : vector<8x128xi32>
    %c8_i32_176 = arith.constant 8 : i32
    %517 = vector.broadcast %c8_i32_176 : i32 to vector<8x128xi32>
    %518 = arith.shrui %516, %517 : vector<8x128xi32>
    %519 = arith.uitofp %518 : vector<8x128xi32> to vector<8x128xf32>
    %cst_177 = arith.constant 0x4B800000 : f32
    %520 = vector.broadcast %cst_177 : f32 to vector<8x128xf32>
    %521 = arith.mulf %500, %520 : vector<8x128xf32>
    %522 = arith.cmpf olt, %519, %521 : vector<8x128xf32>
    %523 = arith.extui %522 : vector<8x128xi1> to vector<8x128xi32>
    %524 = arith.sitofp %523 : vector<8x128xi32> to vector<8x128xf32>
    %cst_178 = arith.constant 1.000000e+00 : f32
    %525 = vector.broadcast %cst_178 : f32 to vector<8x128xf32>
    %526 = arith.subf %525, %524 : vector<8x128xf32>
    %527 = arith.mulf %493, %526 : vector<8x128xf32>
    %528 = arith.truncf %524 : vector<8x128xf32> to vector<8x128xbf16>
    %cst_179 = arith.constant dense<0.000000e+00> : vector<8x128xf32>
    %529 = tpu.matmul %528, %6, %cst_179 {dimension_numbers = #tpu.dot_dimension_numbers<[1], [0], [0], [1], [0, 0, 1, 1], [], []>} : vector<8x128xbf16>, vector<128x128xbf16>, vector<8x128xf32> -> vector<8x128xf32>
    %530 = vector.broadcast %7 : vector<1x128xf32> to vector<8x128xf32>
    %531 = arith.addf %529, %530 : vector<8x128xf32>
    %cst_180 = arith.constant 0.818730771 : f32
    %532 = vector.broadcast %cst_180 : f32 to vector<8x128xf32>
    %533 = arith.mulf %532, %474 : vector<8x128xf32>
    %534 = arith.addf %533, %531 : vector<8x128xf32>
    %cst_181 = arith.constant 1.000000e+00 : f32
    %535 = vector.broadcast %cst_181 : f32 to vector<8x128xf32>
    %536 = arith.subf %534, %535 : vector<8x128xf32>
    %537 = arith.negf %536 : vector<8x128xf32>
    %538 = math.exp %537 : vector<8x128xf32>
    %cst_182 = arith.constant 1.000000e+00 : f32
    %539 = vector.broadcast %cst_182 : f32 to vector<8x128xf32>
    %540 = arith.addf %539, %538 : vector<8x128xf32>
    %541 = arith.divf %539, %540 : vector<8x128xf32>
    %c-1640531527_i32_183 = arith.constant -1640531527 : i32
    %542 = arith.muli %490, %c-1640531527_i32_183 : i32
    %543 = vector.broadcast %542 : i32 to vector<8x128xi32>
    %544 = arith.xori %14, %543 : vector<8x128xi32>
    %c16_i32_184 = arith.constant 16 : i32
    %545 = vector.broadcast %c16_i32_184 : i32 to vector<8x128xi32>
    %546 = arith.shrui %544, %545 : vector<8x128xi32>
    %547 = arith.xori %544, %546 : vector<8x128xi32>
    %c2146121005_i32_185 = arith.constant 2146121005 : i32
    %548 = vector.broadcast %c2146121005_i32_185 : i32 to vector<8x128xi32>
    %549 = arith.muli %547, %548 : vector<8x128xi32>
    %c15_i32_186 = arith.constant 15 : i32
    %550 = vector.broadcast %c15_i32_186 : i32 to vector<8x128xi32>
    %551 = arith.shrui %549, %550 : vector<8x128xi32>
    %552 = arith.xori %549, %551 : vector<8x128xi32>
    %c-2073254261_i32_187 = arith.constant -2073254261 : i32
    %553 = vector.broadcast %c-2073254261_i32_187 : i32 to vector<8x128xi32>
    %554 = arith.muli %552, %553 : vector<8x128xi32>
    %c16_i32_188 = arith.constant 16 : i32
    %555 = vector.broadcast %c16_i32_188 : i32 to vector<8x128xi32>
    %556 = arith.shrui %554, %555 : vector<8x128xi32>
    %557 = arith.xori %554, %556 : vector<8x128xi32>
    %c8_i32_189 = arith.constant 8 : i32
    %558 = vector.broadcast %c8_i32_189 : i32 to vector<8x128xi32>
    %559 = arith.shrui %557, %558 : vector<8x128xi32>
    %560 = arith.uitofp %559 : vector<8x128xi32> to vector<8x128xf32>
    %cst_190 = arith.constant 0x4B800000 : f32
    %561 = vector.broadcast %cst_190 : f32 to vector<8x128xf32>
    %562 = arith.mulf %541, %561 : vector<8x128xf32>
    %563 = arith.cmpf olt, %560, %562 : vector<8x128xf32>
    %564 = arith.extui %563 : vector<8x128xi1> to vector<8x128xi32>
    %565 = arith.sitofp %564 : vector<8x128xi32> to vector<8x128xf32>
    %cst_191 = arith.constant 1.000000e+00 : f32
    %566 = vector.broadcast %cst_191 : f32 to vector<8x128xf32>
    %567 = arith.subf %566, %565 : vector<8x128xf32>
    %568 = arith.mulf %534, %567 : vector<8x128xf32>
    %569 = arith.truncf %565 : vector<8x128xf32> to vector<8x128xbf16>
    %cst_192 = arith.constant dense<0.000000e+00> : vector<8x10xf32>
    %570 = tpu.matmul %569, %8, %cst_192 {dimension_numbers = #tpu.dot_dimension_numbers<[1], [0], [0], [1], [0, 0, 1, 1], [], []>} : vector<8x128xbf16>, vector<128x10xbf16>, vector<8x10xf32> -> vector<8x10xf32>
    %571 = vector.broadcast %9 : vector<1x10xf32> to vector<8x10xf32>
    %572 = arith.addf %570, %571 : vector<8x10xf32>
    %573 = arith.subf %572, %482 : vector<8x10xf32>
    %cst_193 = arith.constant 2.000000e-01 : f32
    %574 = vector.broadcast %cst_193 : f32 to vector<8x10xf32>
    %575 = arith.mulf %574, %573 : vector<8x10xf32>
    %576 = arith.addf %482, %575 : vector<8x10xf32>
    %577 = arith.subf %576, %486 : vector<8x10xf32>
    %cst_194 = arith.constant 1.000000e-01 : f32
    %578 = vector.broadcast %cst_194 : f32 to vector<8x10xf32>
    %579 = arith.mulf %578, %577 : vector<8x10xf32>
    %580 = arith.addf %486, %579 : vector<8x10xf32>
    %581 = arith.maximumf %487, %580 : vector<8x10xf32>
    %c6_i32 = arith.constant 6 : i32
    %c2_i32_195 = arith.constant 2 : i32
    %582 = arith.muli %c6_i32, %c2_i32_195 : i32
    %c1234_i32_196 = arith.constant 1234 : i32
    %583 = arith.addi %c1234_i32_196, %582 : i32
    %c1_i32_197 = arith.constant 1 : i32
    %584 = arith.addi %583, %c1_i32_197 : i32
    %cst_198 = arith.constant 0.818730771 : f32
    %585 = vector.broadcast %cst_198 : f32 to vector<8x128xf32>
    %586 = arith.mulf %585, %527 : vector<8x128xf32>
    %587 = arith.addf %586, %5 : vector<8x128xf32>
    %cst_199 = arith.constant 1.000000e+00 : f32
    %588 = vector.broadcast %cst_199 : f32 to vector<8x128xf32>
    %589 = arith.subf %587, %588 : vector<8x128xf32>
    %590 = arith.negf %589 : vector<8x128xf32>
    %591 = math.exp %590 : vector<8x128xf32>
    %cst_200 = arith.constant 1.000000e+00 : f32
    %592 = vector.broadcast %cst_200 : f32 to vector<8x128xf32>
    %593 = arith.addf %592, %591 : vector<8x128xf32>
    %594 = arith.divf %592, %593 : vector<8x128xf32>
    %c-1640531527_i32_201 = arith.constant -1640531527 : i32
    %595 = arith.muli %583, %c-1640531527_i32_201 : i32
    %596 = vector.broadcast %595 : i32 to vector<8x128xi32>
    %597 = arith.xori %14, %596 : vector<8x128xi32>
    %c16_i32_202 = arith.constant 16 : i32
    %598 = vector.broadcast %c16_i32_202 : i32 to vector<8x128xi32>
    %599 = arith.shrui %597, %598 : vector<8x128xi32>
    %600 = arith.xori %597, %599 : vector<8x128xi32>
    %c2146121005_i32_203 = arith.constant 2146121005 : i32
    %601 = vector.broadcast %c2146121005_i32_203 : i32 to vector<8x128xi32>
    %602 = arith.muli %600, %601 : vector<8x128xi32>
    %c15_i32_204 = arith.constant 15 : i32
    %603 = vector.broadcast %c15_i32_204 : i32 to vector<8x128xi32>
    %604 = arith.shrui %602, %603 : vector<8x128xi32>
    %605 = arith.xori %602, %604 : vector<8x128xi32>
    %c-2073254261_i32_205 = arith.constant -2073254261 : i32
    %606 = vector.broadcast %c-2073254261_i32_205 : i32 to vector<8x128xi32>
    %607 = arith.muli %605, %606 : vector<8x128xi32>
    %c16_i32_206 = arith.constant 16 : i32
    %608 = vector.broadcast %c16_i32_206 : i32 to vector<8x128xi32>
    %609 = arith.shrui %607, %608 : vector<8x128xi32>
    %610 = arith.xori %607, %609 : vector<8x128xi32>
    %c8_i32_207 = arith.constant 8 : i32
    %611 = vector.broadcast %c8_i32_207 : i32 to vector<8x128xi32>
    %612 = arith.shrui %610, %611 : vector<8x128xi32>
    %613 = arith.uitofp %612 : vector<8x128xi32> to vector<8x128xf32>
    %cst_208 = arith.constant 0x4B800000 : f32
    %614 = vector.broadcast %cst_208 : f32 to vector<8x128xf32>
    %615 = arith.mulf %594, %614 : vector<8x128xf32>
    %616 = arith.cmpf olt, %613, %615 : vector<8x128xf32>
    %617 = arith.extui %616 : vector<8x128xi1> to vector<8x128xi32>
    %618 = arith.sitofp %617 : vector<8x128xi32> to vector<8x128xf32>
    %cst_209 = arith.constant 1.000000e+00 : f32
    %619 = vector.broadcast %cst_209 : f32 to vector<8x128xf32>
    %620 = arith.subf %619, %618 : vector<8x128xf32>
    %621 = arith.mulf %587, %620 : vector<8x128xf32>
    %622 = arith.truncf %618 : vector<8x128xf32> to vector<8x128xbf16>
    %cst_210 = arith.constant dense<0.000000e+00> : vector<8x128xf32>
    %623 = tpu.matmul %622, %6, %cst_210 {dimension_numbers = #tpu.dot_dimension_numbers<[1], [0], [0], [1], [0, 0, 1, 1], [], []>} : vector<8x128xbf16>, vector<128x128xbf16>, vector<8x128xf32> -> vector<8x128xf32>
    %624 = vector.broadcast %7 : vector<1x128xf32> to vector<8x128xf32>
    %625 = arith.addf %623, %624 : vector<8x128xf32>
    %cst_211 = arith.constant 0.818730771 : f32
    %626 = vector.broadcast %cst_211 : f32 to vector<8x128xf32>
    %627 = arith.mulf %626, %568 : vector<8x128xf32>
    %628 = arith.addf %627, %625 : vector<8x128xf32>
    %cst_212 = arith.constant 1.000000e+00 : f32
    %629 = vector.broadcast %cst_212 : f32 to vector<8x128xf32>
    %630 = arith.subf %628, %629 : vector<8x128xf32>
    %631 = arith.negf %630 : vector<8x128xf32>
    %632 = math.exp %631 : vector<8x128xf32>
    %cst_213 = arith.constant 1.000000e+00 : f32
    %633 = vector.broadcast %cst_213 : f32 to vector<8x128xf32>
    %634 = arith.addf %633, %632 : vector<8x128xf32>
    %635 = arith.divf %633, %634 : vector<8x128xf32>
    %c-1640531527_i32_214 = arith.constant -1640531527 : i32
    %636 = arith.muli %584, %c-1640531527_i32_214 : i32
    %637 = vector.broadcast %636 : i32 to vector<8x128xi32>
    %638 = arith.xori %14, %637 : vector<8x128xi32>
    %c16_i32_215 = arith.constant 16 : i32
    %639 = vector.broadcast %c16_i32_215 : i32 to vector<8x128xi32>
    %640 = arith.shrui %638, %639 : vector<8x128xi32>
    %641 = arith.xori %638, %640 : vector<8x128xi32>
    %c2146121005_i32_216 = arith.constant 2146121005 : i32
    %642 = vector.broadcast %c2146121005_i32_216 : i32 to vector<8x128xi32>
    %643 = arith.muli %641, %642 : vector<8x128xi32>
    %c15_i32_217 = arith.constant 15 : i32
    %644 = vector.broadcast %c15_i32_217 : i32 to vector<8x128xi32>
    %645 = arith.shrui %643, %644 : vector<8x128xi32>
    %646 = arith.xori %643, %645 : vector<8x128xi32>
    %c-2073254261_i32_218 = arith.constant -2073254261 : i32
    %647 = vector.broadcast %c-2073254261_i32_218 : i32 to vector<8x128xi32>
    %648 = arith.muli %646, %647 : vector<8x128xi32>
    %c16_i32_219 = arith.constant 16 : i32
    %649 = vector.broadcast %c16_i32_219 : i32 to vector<8x128xi32>
    %650 = arith.shrui %648, %649 : vector<8x128xi32>
    %651 = arith.xori %648, %650 : vector<8x128xi32>
    %c8_i32_220 = arith.constant 8 : i32
    %652 = vector.broadcast %c8_i32_220 : i32 to vector<8x128xi32>
    %653 = arith.shrui %651, %652 : vector<8x128xi32>
    %654 = arith.uitofp %653 : vector<8x128xi32> to vector<8x128xf32>
    %cst_221 = arith.constant 0x4B800000 : f32
    %655 = vector.broadcast %cst_221 : f32 to vector<8x128xf32>
    %656 = arith.mulf %635, %655 : vector<8x128xf32>
    %657 = arith.cmpf olt, %654, %656 : vector<8x128xf32>
    %658 = arith.extui %657 : vector<8x128xi1> to vector<8x128xi32>
    %659 = arith.sitofp %658 : vector<8x128xi32> to vector<8x128xf32>
    %cst_222 = arith.constant 1.000000e+00 : f32
    %660 = vector.broadcast %cst_222 : f32 to vector<8x128xf32>
    %661 = arith.subf %660, %659 : vector<8x128xf32>
    %662 = arith.mulf %628, %661 : vector<8x128xf32>
    %663 = arith.truncf %659 : vector<8x128xf32> to vector<8x128xbf16>
    %cst_223 = arith.constant dense<0.000000e+00> : vector<8x10xf32>
    %664 = tpu.matmul %663, %8, %cst_223 {dimension_numbers = #tpu.dot_dimension_numbers<[1], [0], [0], [1], [0, 0, 1, 1], [], []>} : vector<8x128xbf16>, vector<128x10xbf16>, vector<8x10xf32> -> vector<8x10xf32>
    %665 = vector.broadcast %9 : vector<1x10xf32> to vector<8x10xf32>
    %666 = arith.addf %664, %665 : vector<8x10xf32>
    %667 = arith.subf %666, %576 : vector<8x10xf32>
    %cst_224 = arith.constant 2.000000e-01 : f32
    %668 = vector.broadcast %cst_224 : f32 to vector<8x10xf32>
    %669 = arith.mulf %668, %667 : vector<8x10xf32>
    %670 = arith.addf %576, %669 : vector<8x10xf32>
    %671 = arith.subf %670, %580 : vector<8x10xf32>
    %cst_225 = arith.constant 1.000000e-01 : f32
    %672 = vector.broadcast %cst_225 : f32 to vector<8x10xf32>
    %673 = arith.mulf %672, %671 : vector<8x10xf32>
    %674 = arith.addf %580, %673 : vector<8x10xf32>
    %675 = arith.maximumf %581, %674 : vector<8x10xf32>
    %c7_i32 = arith.constant 7 : i32
    %c2_i32_226 = arith.constant 2 : i32
    %676 = arith.muli %c7_i32, %c2_i32_226 : i32
    %c1234_i32_227 = arith.constant 1234 : i32
    %677 = arith.addi %c1234_i32_227, %676 : i32
    %c1_i32_228 = arith.constant 1 : i32
    %678 = arith.addi %677, %c1_i32_228 : i32
    %cst_229 = arith.constant 0.818730771 : f32
    %679 = vector.broadcast %cst_229 : f32 to vector<8x128xf32>
    %680 = arith.mulf %679, %621 : vector<8x128xf32>
    %681 = arith.addf %680, %5 : vector<8x128xf32>
    %cst_230 = arith.constant 1.000000e+00 : f32
    %682 = vector.broadcast %cst_230 : f32 to vector<8x128xf32>
    %683 = arith.subf %681, %682 : vector<8x128xf32>
    %684 = arith.negf %683 : vector<8x128xf32>
    %685 = math.exp %684 : vector<8x128xf32>
    %cst_231 = arith.constant 1.000000e+00 : f32
    %686 = vector.broadcast %cst_231 : f32 to vector<8x128xf32>
    %687 = arith.addf %686, %685 : vector<8x128xf32>
    %688 = arith.divf %686, %687 : vector<8x128xf32>
    %c-1640531527_i32_232 = arith.constant -1640531527 : i32
    %689 = arith.muli %677, %c-1640531527_i32_232 : i32
    %690 = vector.broadcast %689 : i32 to vector<8x128xi32>
    %691 = arith.xori %14, %690 : vector<8x128xi32>
    %c16_i32_233 = arith.constant 16 : i32
    %692 = vector.broadcast %c16_i32_233 : i32 to vector<8x128xi32>
    %693 = arith.shrui %691, %692 : vector<8x128xi32>
    %694 = arith.xori %691, %693 : vector<8x128xi32>
    %c2146121005_i32_234 = arith.constant 2146121005 : i32
    %695 = vector.broadcast %c2146121005_i32_234 : i32 to vector<8x128xi32>
    %696 = arith.muli %694, %695 : vector<8x128xi32>
    %c15_i32_235 = arith.constant 15 : i32
    %697 = vector.broadcast %c15_i32_235 : i32 to vector<8x128xi32>
    %698 = arith.shrui %696, %697 : vector<8x128xi32>
    %699 = arith.xori %696, %698 : vector<8x128xi32>
    %c-2073254261_i32_236 = arith.constant -2073254261 : i32
    %700 = vector.broadcast %c-2073254261_i32_236 : i32 to vector<8x128xi32>
    %701 = arith.muli %699, %700 : vector<8x128xi32>
    %c16_i32_237 = arith.constant 16 : i32
    %702 = vector.broadcast %c16_i32_237 : i32 to vector<8x128xi32>
    %703 = arith.shrui %701, %702 : vector<8x128xi32>
    %704 = arith.xori %701, %703 : vector<8x128xi32>
    %c8_i32_238 = arith.constant 8 : i32
    %705 = vector.broadcast %c8_i32_238 : i32 to vector<8x128xi32>
    %706 = arith.shrui %704, %705 : vector<8x128xi32>
    %707 = arith.uitofp %706 : vector<8x128xi32> to vector<8x128xf32>
    %cst_239 = arith.constant 0x4B800000 : f32
    %708 = vector.broadcast %cst_239 : f32 to vector<8x128xf32>
    %709 = arith.mulf %688, %708 : vector<8x128xf32>
    %710 = arith.cmpf olt, %707, %709 : vector<8x128xf32>
    %711 = arith.extui %710 : vector<8x128xi1> to vector<8x128xi32>
    %712 = arith.sitofp %711 : vector<8x128xi32> to vector<8x128xf32>
    %713 = arith.truncf %712 : vector<8x128xf32> to vector<8x128xbf16>
    %cst_240 = arith.constant dense<0.000000e+00> : vector<8x128xf32>
    %714 = tpu.matmul %713, %6, %cst_240 {dimension_numbers = #tpu.dot_dimension_numbers<[1], [0], [0], [1], [0, 0, 1, 1], [], []>} : vector<8x128xbf16>, vector<128x128xbf16>, vector<8x128xf32> -> vector<8x128xf32>
    %715 = vector.broadcast %7 : vector<1x128xf32> to vector<8x128xf32>
    %716 = arith.addf %714, %715 : vector<8x128xf32>
    %cst_241 = arith.constant 0.818730771 : f32
    %717 = vector.broadcast %cst_241 : f32 to vector<8x128xf32>
    %718 = arith.mulf %717, %662 : vector<8x128xf32>
    %719 = arith.addf %718, %716 : vector<8x128xf32>
    %cst_242 = arith.constant 1.000000e+00 : f32
    %720 = vector.broadcast %cst_242 : f32 to vector<8x128xf32>
    %721 = arith.subf %719, %720 : vector<8x128xf32>
    %722 = arith.negf %721 : vector<8x128xf32>
    %723 = math.exp %722 : vector<8x128xf32>
    %cst_243 = arith.constant 1.000000e+00 : f32
    %724 = vector.broadcast %cst_243 : f32 to vector<8x128xf32>
    %725 = arith.addf %724, %723 : vector<8x128xf32>
    %726 = arith.divf %724, %725 : vector<8x128xf32>
    %c-1640531527_i32_244 = arith.constant -1640531527 : i32
    %727 = arith.muli %678, %c-1640531527_i32_244 : i32
    %728 = vector.broadcast %727 : i32 to vector<8x128xi32>
    %729 = arith.xori %14, %728 : vector<8x128xi32>
    %c16_i32_245 = arith.constant 16 : i32
    %730 = vector.broadcast %c16_i32_245 : i32 to vector<8x128xi32>
    %731 = arith.shrui %729, %730 : vector<8x128xi32>
    %732 = arith.xori %729, %731 : vector<8x128xi32>
    %c2146121005_i32_246 = arith.constant 2146121005 : i32
    %733 = vector.broadcast %c2146121005_i32_246 : i32 to vector<8x128xi32>
    %734 = arith.muli %732, %733 : vector<8x128xi32>
    %c15_i32_247 = arith.constant 15 : i32
    %735 = vector.broadcast %c15_i32_247 : i32 to vector<8x128xi32>
    %736 = arith.shrui %734, %735 : vector<8x128xi32>
    %737 = arith.xori %734, %736 : vector<8x128xi32>
    %c-2073254261_i32_248 = arith.constant -2073254261 : i32
    %738 = vector.broadcast %c-2073254261_i32_248 : i32 to vector<8x128xi32>
    %739 = arith.muli %737, %738 : vector<8x128xi32>
    %c16_i32_249 = arith.constant 16 : i32
    %740 = vector.broadcast %c16_i32_249 : i32 to vector<8x128xi32>
    %741 = arith.shrui %739, %740 : vector<8x128xi32>
    %742 = arith.xori %739, %741 : vector<8x128xi32>
    %c8_i32_250 = arith.constant 8 : i32
    %743 = vector.broadcast %c8_i32_250 : i32 to vector<8x128xi32>
    %744 = arith.shrui %742, %743 : vector<8x128xi32>
    %745 = arith.uitofp %744 : vector<8x128xi32> to vector<8x128xf32>
    %cst_251 = arith.constant 0x4B800000 : f32
    %746 = vector.broadcast %cst_251 : f32 to vector<8x128xf32>
    %747 = arith.mulf %726, %746 : vector<8x128xf32>
    %748 = arith.cmpf olt, %745, %747 : vector<8x128xf32>
    %749 = arith.extui %748 : vector<8x128xi1> to vector<8x128xi32>
    %750 = arith.sitofp %749 : vector<8x128xi32> to vector<8x128xf32>
    %751 = arith.truncf %750 : vector<8x128xf32> to vector<8x128xbf16>
    %cst_252 = arith.constant dense<0.000000e+00> : vector<8x10xf32>
    %752 = tpu.matmul %751, %8, %cst_252 {dimension_numbers = #tpu.dot_dimension_numbers<[1], [0], [0], [1], [0, 0, 1, 1], [], []>} : vector<8x128xbf16>, vector<128x10xbf16>, vector<8x10xf32> -> vector<8x10xf32>
    %753 = vector.broadcast %9 : vector<1x10xf32> to vector<8x10xf32>
    %754 = arith.addf %752, %753 : vector<8x10xf32>
    %755 = arith.subf %754, %670 : vector<8x10xf32>
    %cst_253 = arith.constant 2.000000e-01 : f32
    %756 = vector.broadcast %cst_253 : f32 to vector<8x10xf32>
    %757 = arith.mulf %756, %755 : vector<8x10xf32>
    %758 = arith.addf %670, %757 : vector<8x10xf32>
    %759 = arith.subf %758, %674 : vector<8x10xf32>
    %cst_254 = arith.constant 1.000000e-01 : f32
    %760 = vector.broadcast %cst_254 : f32 to vector<8x10xf32>
    %761 = arith.mulf %760, %759 : vector<8x10xf32>
    %762 = arith.addf %674, %761 : vector<8x10xf32>
    %763 = arith.maximumf %675, %762 : vector<8x10xf32>
    %cst_255 = arith.constant dense<0xFF800000> : vector<8xf32>
    %764 = vector.multi_reduction <maximumf>, %763, %cst_255 [1] : vector<8x10xf32> to vector<8xf32>
    %765 = vector.shape_cast %764 : vector<8xf32> to vector<8x1xf32>
    %766 = vector.broadcast %765 : vector<8x1xf32> to vector<8x10xf32>
    %767 = arith.subf %763, %766 : vector<8x10xf32>
    %768 = math.exp %767 : vector<8x10xf32>
    %cst_256 = arith.constant dense<0.000000e+00> : vector<8xf32>
    %769 = vector.multi_reduction <add>, %768, %cst_256 [1] : vector<8x10xf32> to vector<8xf32>
    %770 = vector.shape_cast %769 : vector<8xf32> to vector<8x1xf32>
    %771 = math.log %770 : vector<8x1xf32>
    %772 = arith.addf %765, %771 : vector<8x1xf32>
    %773 = vector.broadcast %772 : vector<8x1xf32> to vector<8x10xf32>
    %774 = arith.subf %763, %773 : vector<8x10xf32>
    %c0_257 = arith.constant 0 : index
    %c0_258 = arith.constant 0 : index
    %775 = vector.load %arg7[%c0_257, %c0_258] : memref<8x10xf32, #tpu.memory_space<vmem>>, vector<8x10xf32>
    tpu.vector_store %arg7[%c0_257, %c0_258], %774 {strides = array<i32>} : memref<8x10xf32, #tpu.memory_space<vmem>>, vector<8x10xf32>,
    return
  }
}

</mosaic_0001>

<bundles_post_ra>
// kernel: tpu_custom_call.1
= control target key start
LH: loop header
LB: loop body
LE: loop exit
PB: predicated region body
PF: predicated region fallthrough
CT: control target
= control target key end

     0   :  { %12 = vsyncpa [#allocation3], 0  ;;  %s2191_s0 = inlined_call_operand.hbm [shape: f32[8,784], index: 0, kind: input, shape index: {}]   ;;  %s2192_s1 = inlined_call_operand.hbm [shape: f32[784,128], index: 1, kind: input, shape index: {}]   ;;  %s2193_s2 = inlined_call_operand.vmem [shape: f32[1,128], index: 2, kind: input, shape index: {}]   ;;  %s2194_s3 = inlined_call_operand.vmem [shape: bf16[128,128], index: 3, kind: input, shape index: {}]   ;;  %s2195_s4 = inlined_call_operand.vmem [shape: f32[1,128], index: 4, kind: input, shape index: {}]   ;;  %s2196_s5 = inlined_call_operand.vmem [shape: bf16[128,10], index: 5, kind: input, shape index: {}]   ;;  %s2197_s6 = inlined_call_operand.vmem [shape: f32[1,10], index: 6, kind: input, shape index: {}]   ;;  %s2198_s7 = inlined_call_operand.hbm [shape: f32[8,10], index: 7, kind: output, shape index: {}]  }
   0x1   :  { %13 = vsyncpa [#allocation6], 0 }
   0x2   :  { %14 = vsyncpa [#allocation4], 0  ;;  %s20_s26 = sshll.u32 %s2191_s0, 4  ;;  %s1778_s27 = smov [#allocation2]   ;;  %s21_s26 = int_to_ptr.hbm [resolvable:$true] %s20_s26 }
   0x3   :  { %s22_s28 = sshll.u32 %s1778_s27, 4  ;;  %s30_s8 = sshll.u32 %s2192_s1, 4  ;;  %s23_s28 = int_to_ptr.vmem [resolvable:$true] %s22_s28  ;;  %s31_s8 = int_to_ptr.hbm [resolvable:$true] %s30_s8 }
   0x4   :  { %25 = dma.hbm_to_vmem [thread:$0]  %s21_s26, 896, %s23_s28, [#allocation3]  }
   0x5   :  { %s1779_s9 = smov [#allocation5]   ;;  %s1780_s11 = smov 128  }
   0x6   :  { %s32_s10 = sshll.u32 %s1779_s9, 4  ;;  %s1781_s12 = smov 8   ;;  %s33_s10 = int_to_ptr.vmem [resolvable:$true] %s32_s10 }
   0x7   :  { %38 = dma.hbm_to_vmem [thread:$0]  %s31_s8, 12544, %s33_s10, [#allocation6], %s1780_s11, %s1780_s11, %s1781_s12  }
   0x8   :  { %1772 = dma.done.wait [#allocation3], 896  }
   0x9   :  { %1773 = vsyncadd [#allocation3], 4294966400 }
   0xa   :  { %1774 = dma.done.wait [#allocation6], 12544  }
   0xb   :  { %1775 = vsyncadd [#allocation6], 4294954752  ;;  %v79_v0 = vld [vmem:[#allocation5 + $0x78] sm:$0xff]  ;;  %v78_v1 = vld [vmem:[#allocation5 + $0x70] sm:$0xff]  ;;  %vm166_vm0 = vcmask 130048   ;;  %s1449_s24 = sshll.u32 %s2198_s7, 4  ;;  %s1450_s24 = int_to_ptr.hbm [resolvable:$true] %s1449_s24 }
   0xc   :  { %v95_v2 = vld [vmem:[#allocation5 + $0xf8] sm:$0xff]  ;;  %170 = vmatpush.msra.mxu0 %v79_v0  ;;  %v94_v3 = vld [vmem:[#allocation5 + $0xf0] sm:$0xff]  ;;  %v77_v4 = vld [vmem:[#allocation5 + $0x68] sm:$0xff] }
   0xd   :  { %190 = vmatpush.msra.mxu1 %v95_v2  ;;  %v93_v5 = vld [vmem:[#allocation5 + $0xe8] sm:$0xff]  ;;  %v76_v6 = vld [vmem:[#allocation5 + $0x60] sm:$0xff]  ;;  %v75_v8 = vld [vmem:[#allocation5 + $0x58] sm:$0xff] }
   0xe   :  { %171 = vmatpush.msra.mxu0 %v78_v1  ;;  %v92_v7 = vld [vmem:[#allocation5 + $0xe0] sm:$0xff]  ;;  %v91_v9 = vld [vmem:[#allocation5 + $0xd8] sm:$0xff]  ;;  %v74_v10 = vld [vmem:[#allocation5 + $0x50] sm:$0xff] }
   0xf   :  { %191 = vmatpush.msra.mxu1 %v94_v3  ;;  %v111_v11 = vld [vmem:[#allocation5 + $0x178] sm:$0xff]  ;;  %v90_v12 = vld [vmem:[#allocation5 + $0xd0] sm:$0xff]  ;;  %v109_v15 = vld [vmem:[#allocation5 + $0x168] sm:$0xff] }
  0x10   :  { %172 = vmatpush.msra.mxu0 %v77_v4  ;;  %210 = vmatpush.msra.mxu2 %v111_v11  ;;  %v110_v13 = vld [vmem:[#allocation5 + $0x170] sm:$0xff]  ;;  %v127_v14 = vld [vmem:[#allocation5 + $0x1f8] sm:$0xff]  ;;  %v73_v17 = vld [vmem:[#allocation5 + $0x48] sm:$0xff] }
  0x11   :  { %192 = vmatpush.msra.mxu1 %v93_v5  ;;  %v126_v16 = vld [vmem:[#allocation5 + $0x1f0] sm:$0xff]  ;;  %v89_v18 = vld [vmem:[#allocation5 + $0xc8] sm:$0xff]  ;;  %230 = vmatpush.msra.mxu3 %v127_v14  ;;  %v108_v19 = vld [vmem:[#allocation5 + $0x160] sm:$0xff] }
  0x12   :  { %173 = vmatpush.msra.mxu0 %v76_v6  ;;  %211 = vmatpush.msra.mxu2 %v110_v13  ;;  %v125_v20 = vld [vmem:[#allocation5 + $0x1e8] sm:$0xff]  ;;  %v72_v21 = vld [vmem:[#allocation5 + $0x40] sm:$0xff]  ;;  %v107_v23 = vld [vmem:[#allocation5 + $0x158] sm:$0xff] }
  0x13   :  { %193 = vmatpush.msra.mxu1 %v92_v7  ;;  %v88_v22 = vld [vmem:[#allocation5 + $0xc0] sm:$0xff]  ;;  %231 = vmatpush.msra.mxu3 %v126_v16  ;;  %v71_v25 = vld [vmem:[#allocation5 + $0x38] sm:$0xff]  ;;  %v106_v27 = vld [vmem:[#allocation5 + $0x150] sm:$0xff] }
  0x14   :  { %174 = vmatpush.msra.mxu0 %v75_v8  ;;  %212 = vmatpush.msra.mxu2 %v109_v15  ;;  %v124_v24 = vld [vmem:[#allocation5 + $0x1e0] sm:$0xff]  ;;  %v87_v26 = vld [vmem:[#allocation5 + $0xb8] sm:$0xff]  ;;  %v70_v29 = vld [vmem:[#allocation5 + $0x30] sm:$0xff] }
  0x15   :  { %194 = vmatpush.msra.mxu1 %v91_v9  ;;  %232 = vmatpush.msra.mxu3 %v125_v20  ;;  %v123_v28 = vld [vmem:[#allocation5 + $0x1d8] sm:$0xff]  ;;  %v86_v30 = vld [vmem:[#allocation5 + $0xb0] sm:$0xff]  ;;  %v105_v31 = vld [vmem:[#allocation5 + $0x148] sm:$0xff] }
  0x16   :  { %175 = vmatpush.msra.mxu0 %v74_v10  ;;  %213 = vmatpush.msra.mxu2 %v108_v19  ;;  %v122_v32 = vld [vmem:[#allocation5 + $0x1d0] sm:$0xff]  ;;  %v69_v33 = vld [vmem:[#allocation5 + $0x28] sm:$0xff]  ;;  %v104_v35 = vld [vmem:[#allocation5 + $0x140] sm:$0xff] }
  0x17   :  { %195 = vmatpush.msra.mxu1 %v90_v12  ;;  %233 = vmatpush.msra.mxu3 %v124_v24  ;;  %v85_v34 = vld [vmem:[#allocation5 + $0xa8] sm:$0xff]  ;;  %v68_v37 = vld [vmem:[#allocation5 + $0x20] sm:$0xff]  ;;  %v103_v39 = vld [vmem:[#allocation5 + $0x138] sm:$0xff] }
  0x18   :  { %176 = vmatpush.msra.mxu0 %v73_v17  ;;  %214 = vmatpush.msra.mxu2 %v107_v23  ;;  %v121_v36 = vld [vmem:[#allocation5 + $0x1c8] sm:$0xff]  ;;  %v84_v38 = vld [vmem:[#allocation5 + $0xa0] sm:$0xff]  ;;  %v67_v41 = vld [vmem:[#allocation5 + $0x18] sm:$0xff] }
  0x19   :  { %196 = vmatpush.msra.mxu1 %v89_v18  ;;  %234 = vmatpush.msra.mxu3 %v123_v28  ;;  %v120_v40 = vld [vmem:[#allocation5 + $0x1c0] sm:$0xff]  ;;  %v83_v42 = vld [vmem:[#allocation5 + $0x98] sm:$0xff]  ;;  %v102_v43 = vld [vmem:[#allocation5 + $0x130] sm:$0xff] }
  0x1a   :  { %177 = vmatpush.msra.mxu0 %v72_v21  ;;  %215 = vmatpush.msra.mxu2 %v106_v27  ;;  %v119_v44 = vld [vmem:[#allocation5 + $0x1b8] sm:$0xff]  ;;  %v66_v45 = vld [vmem:[#allocation5 + $0x10] sm:$0xff]  ;;  %v101_v47 = vld [vmem:[#allocation5 + $0x128] sm:$0xff] }
  0x1b   :  { %197 = vmatpush.msra.mxu1 %v88_v22  ;;  %235 = vmatpush.msra.mxu3 %v122_v32  ;;  %v82_v46 = vld [vmem:[#allocation5 + $0x90] sm:$0xff]  ;;  %v65_v49 = vld [vmem:[#allocation5 + $0x8] sm:$0xff]  ;;  %v100_v51 = vld [vmem:[#allocation5 + $0x120] sm:$0xff] }
  0x1c   :  { %178 = vmatpush.msra.mxu0 %v71_v25  ;;  %216 = vmatpush.msra.mxu2 %v105_v31  ;;  %v118_v48 = vld [vmem:[#allocation5 + $0x1b0] sm:$0xff]  ;;  %v81_v50 = vld [vmem:[#allocation5 + $0x88] sm:$0xff]  ;;  %v64_v53 = vld [vmem:[#allocation5] sm:$0xff] }
  0x1d   :  { %198 = vmatpush.msra.mxu1 %v87_v26  ;;  %236 = vmatpush.msra.mxu3 %v121_v36  ;;  %v117_v52 = vld [vmem:[#allocation5 + $0x1a8] sm:$0xff]  ;;  %v80_v54 = vld [vmem:[#allocation5 + $0x80] sm:$0xff]  ;;  %v143_v55 = vld [vmem:[#allocation5 + $0x278] sm:$0xff] }
  0x1e   :  { %179 = vmatpush.msra.mxu0 %v70_v29  ;;  %217 = vmatpush.msra.mxu2 %v104_v35  ;;  %v159_v56 = vld [vmem:[#allocation5 + $0x2f8] sm:$0xff]  ;;  %v116_v58 = vld [vmem:[#allocation5 + $0x1a0] sm:$0xff]  ;;  %v142_v59 = vld [vmem:[#allocation5 + $0x270] sm:$0xff] }
  0x1f   :  { %199 = vmatpush.msra.mxu1 %v86_v30  ;;  %237 = vmatpush.msra.mxu3 %v120_v40  ;;  %v99_v57 = vld [vmem:[#allocation5 + $0x118] sm:$0xff]  ;;  %v158_v60 = vld [vmem:[#allocation5 + $0x2f0] sm:$0xff]  ;;  %v141_v63 = vld [vmem:[#allocation5 + $0x268] sm:$0xff] }
  0x20   :  { %180 = vmatpush.msra.mxu0 %v69_v33  ;;  %218 = vmatpush.msra.mxu2 %v103_v39  ;;  %v98_v61 = vld [vmem:[#allocation5 + $0x110] sm:$0xff]  ;;  %v115_v62 = vld [vmem:[#allocation5 + $0x198] sm:$0xff]  ;;  %v157_v0 = vld [vmem:[#allocation5 + $0x2e8] sm:$0xff] }
  0x21   :  { %200 = vmatpush.msra.mxu1 %v85_v34  ;;  %238 = vmatpush.msra.mxu3 %v119_v44  ;;  %v140_v1 = vld [vmem:[#allocation5 + $0x260] sm:$0xff]  ;;  %v97_v2 = vld [vmem:[#allocation5 + $0x108] sm:$0xff]  ;;  %v114_v3 = vld [vmem:[#allocation5 + $0x190] sm:$0xff] }
  0x22   :  { %181 = vmatpush.msra.mxu0 %v68_v37  ;;  %219 = vmatpush.msra.mxu2 %v102_v43  ;;  %v156_v4 = vld [vmem:[#allocation5 + $0x2e0] sm:$0xff]  ;;  %v113_v6 = vld [vmem:[#allocation5 + $0x188] sm:$0xff]  ;;  %v139_v7 = vld [vmem:[#allocation5 + $0x258] sm:$0xff] }
  0x23   :  { %201 = vmatpush.msra.mxu1 %v84_v38  ;;  %239 = vmatpush.msra.mxu3 %v118_v48  ;;  %v96_v5 = vld [vmem:[#allocation5 + $0x100] sm:$0xff]  ;;  %v155_v8 = vld [vmem:[#allocation5 + $0x2d8] sm:$0xff]  ;;  %v138_v11 = vld [vmem:[#allocation5 + $0x250] sm:$0xff] }
  0x24   :  { %182 = vmatpush.msra.mxu0 %v67_v41  ;;  %220 = vmatpush.msra.mxu2 %v101_v47  ;;  %v59_v9 = vld [vmem:[#allocation2 + $0x10] sm:$0xff]  ;;  %v112_v10 = vld [vmem:[#allocation5 + $0x180] sm:$0xff]  ;;  %v154_v12 = vld [vmem:[#allocation5 + $0x2d0] sm:$0xff]  ;;  %v344_v41 = vlaneseq }
  0x25   :  { %202 = vmatpush.msra.mxu1 %v83_v42  ;;  %240 = vmatpush.msra.mxu3 %v117_v52  ;;  %v161_v13 = vld [vmem:[#allocation5 + $0x308] sm:$0xff]  ;;  %v60_v17 = vld [vmem:[#allocation2 + $0x18] sm:$0xff]  ;;  %v58_v18 = vld [vmem:[#allocation2 + $0x8] sm:$0xff] }
  0x26   :  { %183 = vmatpush.msra.mxu0 %v66_v45  ;;  %221 = vmatpush.msra.mxu2 %v100_v51  ;;  %v57_v14 = vld [vmem:[#allocation2] sm:$0xff]  ;;  %v136_v19 = vld [vmem:[#allocation5 + $0x240] sm:$0xff]  ;;  %v135_v22 = vld [vmem:[#allocation5 + $0x238] sm:$0xff]  ;;  %v345_v43 = vshrl.u32 %v344_v41, 7  ;;  %v348_v44 = vand.u32 127, %v344_v41 }
  0x27   :  { %203 = vmatpush.msra.mxu1 %v82_v46  ;;  %241 = vmatpush.msra.mxu3 %v116_v58  ;;  %v137_v15 = vld [vmem:[#allocation5 + $0x248] sm:$0xff]  ;;  %v152_v20 = vld [vmem:[#allocation5 + $0x2c0] sm:$0xff]  ;;  %v151_v23 = vld [vmem:[#allocation5 + $0x2b8] sm:$0xff] }
  0x28   :  { %184 = vmatpush.msra.mxu0 %v65_v49  ;;  %222 = vmatpush.msra.mxu2 %v99_v57  ;;  %v153_v16 = vld [vmem:[#allocation5 + $0x2c8] sm:$0xff]  ;;  %v160_v21 = vld [vmem:[#allocation5 + $0x300] sm:$0xff]  ;;  %v63_v24 = vld [vmem:[#allocation2 + $0x30] sm:$0xff]  ;;  %v346_v46 = vmul.u32 128, %v345_v43 }
  0x29   :  { %204 = vmatpush.msra.mxu1 %v81_v50  ;;  %242 = vmatpush.msra.mxu3 %v115_v62  ;;  %v134_v25 = vld [vmem:[#allocation5 + $0x230] sm:$0xff]  ;;  %v133_v27 = vld [vmem:[#allocation5 + $0x228] sm:$0xff]  ;;  %v132_v29 = vld [vmem:[#allocation5 + $0x220] sm:$0xff] }
  0x2a   :  { %185 = vmatpush.msra.mxu0 %v64_v53  ;;  %223 = vmatpush.msra.mxu2 %v98_v61  ;;  %v150_v26 = vld [vmem:[#allocation5 + $0x2b0] sm:$0xff]  ;;  %v149_v28 = vld [vmem:[#allocation5 + $0x2a8] sm:$0xff]  ;;  %v148_v30 = vld [vmem:[#allocation5 + $0x2a0] sm:$0xff]  ;;  %v1843_v47 = vadd.s32 %v348_v44, %v346_v46  ;;  %v1783_v46 = vmov 1.0|1.0  }
  0x2b   :  { %205 = vmatpush.msra.mxu1 %v80_v54  ;;  %243 = vmatpush.msra.mxu3 %v114_v3  ;;  %v131_v31 = vld [vmem:[#allocation5 + $0x218] sm:$0xff]  ;;  %v130_v33 = vld [vmem:[#allocation5 + $0x210] sm:$0xff]  ;;  %v129_v35 = vld [vmem:[#allocation5 + $0x208] sm:$0xff] }
  0x2c   :  { %250 = vmatpush.msrb.mxu0 %v143_v55  ;;  %224 = vmatpush.msra.mxu2 %v97_v2  ;;  %v147_v32 = vld [vmem:[#allocation5 + $0x298] sm:$0xff]  ;;  %v146_v34 = vld [vmem:[#allocation5 + $0x290] sm:$0xff]  ;;  %v145_v36 = vld [vmem:[#allocation5 + $0x288] sm:$0xff]  ;;  %v371_v51 = vxor.u32 2808659394, %v1843_v47 }
  0x2d   :  { %270 = vmatpush.msrb.mxu1 %v159_v56  ;;  %244 = vmatpush.msra.mxu3 %v113_v6  ;;  %v128_v37 = vld [vmem:[#allocation5 + $0x200] sm:$0xff]  ;;  %v61_v39 = vld [vmem:[#allocation2 + $0x20] sm:$0xff]  ;;  %v62_v40 = vld [vmem:[#allocation2 + $0x28] sm:$0xff] }
  0x2e   :  { %251 = vmatpush.msrb.mxu0 %v142_v59  ;;  %225 = vmatpush.msra.mxu2 %v96_v5  ;;  %v144_v38 = vld [vmem:[#allocation5 + $0x280] sm:$0xff]  ;;  %v1840_v45 = vld [vmem:[%s2194_s3 + $0x30] sm:$0xff]  ;;  %v1849_v48 = vld [vmem:[%s2194_s3 + $0x28] sm:$0xff]  ;;  %v372_v55 = vshrl.u32 %v371_v51, 16 }
  0x2f   :  { %271 = vmatpush.msrb.mxu1 %v158_v60  ;;  %226 = vmatmul.f32.vlgmr.msra.gmra.mxu2 %v59_v9  ;;  %v1834_v42 = vld [vmem:[%s2194_s3 + $0x38] sm:$0xff]  ;;  %v1628_v49 = vld [vmem:[%s2193_s2] ss:$0 sm:$0xff]  ;;  %v1874_v60 = vld [vmem:[%s2194_s3 + $0x10] sm:$0xff] }
  0x30   :  { %252 = vmatpush.msrb.mxu0 %v141_v63  ;;  %245 = vmatpush.msra.mxu3 %v112_v10  ;;  %v1860_v52 = vld [vmem:[%s2194_s3 + $0x20] sm:$0xff]  ;;  %v1867_v56 = vld [vmem:[%s2194_s3 + $0x18] sm:$0xff]  ;;  %v373_v59 = vxor.u32 %v372_v55, %v371_v51 }
  0x31   :  { %272 = vmatpush.msrb.mxu1 %v157_v0  ;;  %304 = vmatpush.msrb.mxu2 %v161_v13  ;;  %v1881_v0 = vld [vmem:[%s2194_s3 + $0x8] sm:$0xff]  ;;  %v1888_v3 = vld [vmem:[%s2194_s3] sm:$0xff] }
  0x32   :  { %253 = vmatpush.msrb.mxu0 %v140_v1  ;;  %246 = vmatmul.f32.vlgmr.msra.gmra.mxu3 %v60_v17  ;;  %v374_v63 = vmul.u32 2146121005, %v373_v59 }
  0x33   :  { %273 = vmatpush.msrb.mxu1 %v156_v4  ;;  %186 = vmatmul.f32.vlgmr.msra.gmra.mxu0 %v57_v14 }
  0x34   :  { %254 = vmatpush.msrb.mxu0 %v139_v7  ;;  %206 = vmatmul.f32.vlgmr.msra.gmra.mxu1 %v58_v18  ;;  %v375_v2 = vshrl.u32 %v374_v63, 15 }
  0x35   :  { %274 = vmatpush.msrb.mxu1 %v155_v8  ;;  %305 = vmatpush.msrb.mxu2 %v160_v21 }
  0x36   :  { %255 = vmatpush.msrb.mxu0 %v138_v11  ;;  %445 = vmatpush.bf16.msrb.mxu3 %v1834_v42  ;;  %v376_v8 = vxor.u32 %v375_v2, %v374_v63  ;;  %v715_v2 = vxor.u32 541500582, %v1843_v47 }
  0x37   :  { %275 = vmatpush.msrb.mxu1 %v154_v12  ;;  %1460 = vmatmul.msk.f32.vlgmr.msrb.gmra.mxu2 %vm166_vm0, %v63_v24 }
  0x38   :  { %256 = vmatpush.msrb.mxu0 %v137_v15  ;;  %v377_v11 = vmul.u32 2221713035, %v376_v8  ;;  %v716_v8 = vshrl.u32 %v715_v2, 16 }
  0x39   :  { %276 = vmatpush.msrb.mxu1 %v153_v16 }
  0x3a   :  { %257 = vmatpush.msrb.mxu0 %v136_v19  ;;  %446 = vmatpush.bf16.msrb.mxu3 %v1840_v45  ;;  %v378_v14 = vshrl.u32 %v377_v11, 16 }
  0x3b   :  { %277 = vmatpush.msrb.mxu1 %v152_v20  ;;  %v592_v20 = vxor.u32 3822563636, %v1843_v47 }
  0x3c   :  { %258 = vmatpush.msrb.mxu0 %v135_v22  ;;  %v379_v15 = vxor.u32 %v378_v14, %v377_v11 }
  0x3d   :  { %278 = vmatpush.msrb.mxu1 %v151_v23 }
  0x3e   :  { %259 = vmatpush.msrb.mxu0 %v134_v25  ;;  %447 = vmatpush.bf16.msrb.mxu3 %v1849_v48  ;;  %v380_v18 = vshrl.u32 %v379_v15, 8  ;;  %v593_v25 = vshrl.u32 %v592_v20, 16 }
  0x3f   :  { %279 = vmatpush.msrb.mxu1 %v150_v26 }
  0x40   :  { %260 = vmatpush.msrb.mxu0 %v133_v27  ;;  %v381_v19 = vshrl.u32 %v380_v18, 16  ;;  %v382_v24 = vand.u32 65535, %v380_v18 }
  0x41   :  { %280 = vmatpush.msrb.mxu1 %v149_v28 }
  0x42   :  { %261 = vmatpush.msrb.mxu0 %v132_v29  ;;  %448 = vmatpush.bf16.msrb.mxu3 %v1860_v52  ;;  %v383_v22 = vcvt.s32.f32 %v381_v19 }
  0x43   :  { %281 = vmatpush.msrb.mxu1 %v148_v30 }
  0x44   :  { %262 = vmatpush.msrb.mxu0 %v131_v31  ;;  %v384_v28 = vmul.f32 65536.0, %v383_v22  ;;  %v385_v31 = vcvt.s32.f32 %v382_v24 }
  0x45   :  { %282 = vmatpush.msrb.mxu1 %v147_v32  ;;  %v594_v32 = vxor.u32 %v593_v25, %v592_v20 }
  0x46   :  { %263 = vmatpush.msrb.mxu0 %v130_v33  ;;  %449 = vmatpush.bf16.msrb.mxu3 %v1867_v56 }
  0x47   :  { %283 = vmatpush.msrb.mxu1 %v146_v34 }
  0x48   :  { %264 = vmatpush.msrb.mxu0 %v129_v35 }
  0x49   :  { %284 = vmatpush.msrb.mxu1 %v145_v36  ;;  %v386_v36 = vadd.f32 %v385_v31, %v384_v28 }
  0x4a   :  { %265 = vmatpush.msrb.mxu0 %v128_v37  ;;  %450 = vmatpush.bf16.msrb.mxu3 %v1874_v60 }
  0x4b   :  { %285 = vmatpush.msrb.mxu1 %v144_v38  ;;  %266 = vmatmul.f32.vlgmr.msrb.gmra.mxu0 %v61_v39  ;;  %v595_v38 = vmul.u32 2146121005, %v594_v32 }
  0x4c   :  { %286 = vmatmul.f32.vlgmr.msrb.gmra.mxu1 %v62_v40  ;;  %615 = vmatpush.bf16.msra.mxu0 %v1834_v42  ;;  %v1782_v40 = vmov 0.0  }
  0x4d   :  { %v596_v43 = vshrl.u32 %v595_v38, 15 }
  0x4e   :  { %451 = vmatpush.bf16.msrb.mxu3 %v1881_v0 }
  0x50   :  { %616 = vmatpush.bf16.msra.mxu0 %v1840_v45 }
  0x52   :  { %452 = vmatpush.bf16.msrb.mxu3 %v1888_v3 }
  0x54   :  { %617 = vmatpush.bf16.msra.mxu0 %v1849_v48 }
  0x56   :  { %738 = vmatpush.bf16.msra.mxu3 %v1834_v42 }
  0x58   :  { %618 = vmatpush.bf16.msra.mxu0 %v1860_v52 }
  0x5a   :  { %739 = vmatpush.bf16.msra.mxu3 %v1840_v45 }
  0x5c   :  { %619 = vmatpush.bf16.msra.mxu0 %v1867_v56 }
  0x5e   :  { %740 = vmatpush.bf16.msra.mxu3 %v1849_v48 }
  0x60   :  { %620 = vmatpush.bf16.msra.mxu0 %v1874_v60 }
  0x62   :  { %741 = vmatpush.bf16.msra.mxu3 %v1860_v52 }
  0x64   :  { %621 = vmatpush.bf16.msra.mxu0 %v1881_v0 }
  0x66   :  { %742 = vmatpush.bf16.msra.mxu3 %v1867_v56 }
  0x68   :  { %622 = vmatpush.bf16.msra.mxu0 %v1888_v3 }
  0x6a   :  { %743 = vmatpush.bf16.msra.mxu3 %v1874_v60 }
  0x6c   :  { %861 = vmatpush.bf16.msrb.mxu0 %v1834_v42 }
  0x6e   :  { %744 = vmatpush.bf16.msra.mxu3 %v1881_v0 }
  0x70   :  { %862 = vmatpush.bf16.msrb.mxu0 %v1840_v45 }
  0x72   :  { %745 = vmatpush.bf16.msra.mxu3 %v1888_v3 }
  0x74   :  { %863 = vmatpush.bf16.msrb.mxu0 %v1849_v48 }
  0x78   :  { %864 = vmatpush.bf16.msrb.mxu0 %v1860_v52 }
  0x7c   :  { %865 = vmatpush.bf16.msrb.mxu0 %v1867_v56 }
  0x80   :  { %866 = vmatpush.bf16.msrb.mxu0 %v1874_v60 }
  0x84   :  { %867 = vmatpush.bf16.msrb.mxu0 %v1881_v0 }
  0x88   :  { %868 = vmatpush.bf16.msrb.mxu0 %v1888_v3 }
  0xb0   :  { %v187_v50 = vpop.f32.mrf.mxu0 }
  0xb1   :  { %v188_v53 = vadd.f32 %v1628_v49, %v187_v50  ;;  %v207_v54 = vpop.f32.mrf.mxu1  ;;  %v597_v50 = vxor.u32 %v596_v43, %v595_v38 }
  0xb2   :  { %v227_v58 = vpop.f32.mrf.mxu2 }
  0xb3   :  { %v208_v57 = vadd.f32 %v207_v54, %v188_v53  ;;  %v598_v54 = vmul.u32 2221713035, %v597_v50 }
  0xb5   :  { %v228_v61 = vadd.f32 %v227_v58, %v208_v57  ;;  %v247_v62 = vpop.f32.mrf.mxu3  ;;  %v599_v58 = vshrl.u32 %v598_v54, 16 }
  0xb7   :  { %v248_v1 = vadd.f32 %v247_v62, %v228_v61  ;;  %v600_v59 = vxor.u32 %v599_v58, %v598_v54 }
  0xb9   :  { %v601_v63 = vshrl.u32 %v600_v59, 8 }
  0xba   :  { %v307_v7 = vpop.f32.mrf.mxu2 }
  0xc8   :  { %v267_v4 = vpop.f32.mrf.mxu0 }
  0xc9   :  { %v287_v5 = vpop.f32.mrf.mxu1  ;;  %v268_v6 = vadd.f32 %v267_v4, %v248_v1  ;;  %v602_v1 = vshrl.u32 %v601_v63, 16 }
  0xcb   :  { %v288_v9 = vadd.f32 %v287_v5, %v268_v6  ;;  %v604_v5 = vcvt.s32.f32 %v602_v1 }
  0xcd   :  { %v1895_v10 = vadd.f32 %v307_v7, %v288_v9  ;;  %v603_v7 = vand.u32 65535, %v601_v63 }
  0xcf   :  { %v1461_v12 = vadd.f32 -1.0, %v1895_v10  ;;  %v606_v15 = vcvt.s32.f32 %v603_v7 }
  0xd1   :  { %v1462_v13 = vmul.f32 -1.442695, %v1461_v12  ;;  %v605_v12 = vmul.f32 65536.0, %v604_v5 }
  0xd3   :  { %1631 = vpow2.f32 %v1462_v13  ;;  %v607_v20 = vadd.f32 %v606_v15, %v605_v12 }
  0xd9   :  { %v1632_v16 = vpop.eup %1631 }
  0xda   :  { %v355_v17 = vadd.f32 1.0, %v1632_v16  ;;  %v717_v16 = vxor.u32 %v716_v8, %v715_v2 }
  0xdc   :  { %1633 = vrcp.f32 %v355_v17  ;;  %v367_v27 = vand.u32 2147483648, %v355_v17  ;;  %v365_v30 = vand.u32 2147483647, %v355_v17  ;;  %vm361_vm2 = vweird.f32 %v355_v17 }
  0xdd   :  { %v718_v22 = vmul.u32 2146121005, %v717_v16 }
  0xde   :  { %v368_v34 = vor.u32 1.1754944e-38, %v367_v27  ;;  %vm366_vm4 = vcmp.eq.f32.partialorder %v365_v30, 8.507059e+37 }
  0xdf   :  { %v719_v25 = vshrl.u32 %v718_v22, 15 }
  0xe1   :  { %v720_v28 = vxor.u32 %v719_v25, %v718_v22  ;;  %v1960_v25 = vld [vmem:[%s2196_s5 + $0x30] sm:$0xff] }
  0xe2   :  { %v1634_v21 = vpop.eup %1633 }
  0xe3   :  { %v357_v23 = vmul.f32 %v1634_v21, %v355_v17  ;;  %vm362_vm1 = vweird.f32 %v1634_v21  ;;  %v721_v31 = vmul.u32 2221713035, %v720_v28 }
  0xe4   :  { %vm363_vm3 = vmor %vm361_vm2, %vm362_vm1 }
  0xe5   :  { %v358_v26 = vsub.f32 1.0, %v357_v23 }
  0xe7   :  { %v359_v29 = vmul.f32 %v1634_v21, %v358_v26 }
  0xe9   :  { %v360_v33 = vadd.f32 %v1634_v21, %v359_v29 }
  0xeb   :  { %v364_v35 = vsel %vm363_vm3, %v1634_v21, %v360_v33 }
  0xec   :  { %v369_v37 = vsel %vm366_vm4, %v368_v34, %v364_v35  ;;  %v722_v34 = vshrl.u32 %v721_v31, 16 }
  0xed   :  { %v387_v39 = vmul.f32 16777216.0, %v369_v37 }
  0xee   :  { %v723_v35 = vxor.u32 %v722_v34, %v721_v31  ;;  %v1970_v31 = vld [vmem:[%s2196_s5 + $0x28] sm:$0xff] }
  0xef   :  { %vm388_vm5 = vcmp.lt.f32.partialorder %v386_v36, %v387_v39 }
  0xf0   :  { %v1463_v41 = vsel %vm388_vm5, 1.0, %v1782_v40  ;;  %vm1496_vm6 = vmpackc.low %vm388_vm5, %vm388_vm5  ;;  %v724_v38 = vshrl.u32 %v723_v35, 8 }
  0xf1   :  { %v391_v44 = vsub.f32 1.0, %v1463_v41  ;;  %1497 = vmatmul.msk.bf16.vlgmr.msrb.gmra.mxu3 %vm1496_vm6, %v1783_v46  ;;  %v838_v41 = vxor.u32 1555404824, %v1843_v47 }
  0xf2   :  { %984 = vmatpush.bf16.msrb.mxu3 %v1834_v42  ;;  %v725_v39 = vshrl.u32 %v724_v38, 16  ;;  %v726_v50 = vand.u32 65535, %v724_v38 }
  0xf3   :  { %v392_v49 = vmul.f32 %v391_v44, %v1895_v10 }
  0xf4   :  { %v727_v44 = vcvt.s32.f32 %v725_v39  ;;  %v729_v59 = vcvt.s32.f32 %v726_v50  ;;  %v1978_v39 = vld [vmem:[%s2196_s5 + $0x20] sm:$0xff] }
  0xf5   :  { %v570_v51 = vmul.f32 0.8187308, %v392_v49 }
  0xf6   :  { %985 = vmatpush.bf16.msrb.mxu3 %v1840_v45 }
  0xf7   :  { %v571_v53 = vadd.f32 %v570_v51, %v1895_v10  ;;  %v839_v51 = vshrl.u32 %v838_v41, 16 }
  0xf9   :  { %v1535_v55 = vadd.f32 -1.0, %v571_v53 }
  0xfa   :  { %986 = vmatpush.bf16.msrb.mxu3 %v1849_v48 }
  0xfb   :  { %v1536_v57 = vmul.f32 -1.442695, %v1535_v55  ;;  %v728_v55 = vmul.f32 65536.0, %v727_v44 }
  0xfd   :  { %1635 = vpow2.f32 %v1536_v57  ;;  %v730_v2 = vadd.f32 %v729_v59, %v728_v55 }
  0xfe   :  { %987 = vmatpush.bf16.msrb.mxu3 %v1860_v52 }
 0x102   :  { %988 = vmatpush.bf16.msrb.mxu3 %v1867_v56 }
 0x103   :  { %v1636_v61 = vpop.eup %1635 }
 0x104   :  { %v576_v62 = vadd.f32 1.0, %v1636_v61  ;;  %v840_v61 = vxor.u32 %v839_v51, %v838_v41 }
 0x106   :  { %1637 = vrcp.f32 %v576_v62  ;;  %989 = vmatpush.bf16.msrb.mxu3 %v1874_v60  ;;  %v588_v11 = vand.u32 2147483648, %v576_v62  ;;  %v586_v14 = vand.u32 2147483647, %v576_v62  ;;  %vm582_vm8 = vweird.f32 %v576_v62 }
 0x107   :  { %v841_v5 = vmul.u32 2146121005, %v840_v61 }
 0x108   :  { %v589_v18 = vor.u32 1.1754944e-38, %v588_v11  ;;  %vm587_vm10 = vcmp.eq.f32.partialorder %v586_v14, 8.507059e+37 }
 0x109   :  { %v842_v8 = vshrl.u32 %v841_v5, 15 }
 0x10a   :  { %990 = vmatpush.bf16.msrb.mxu3 %v1881_v0 }
 0x10b   :  { %v843_v12 = vxor.u32 %v842_v8, %v841_v5  ;;  %v2001_v5 = vld [vmem:[%s2196_s5 + $0x8] sm:$0xff] }
 0x10c   :  { %v1638_v4 = vpop.eup %1637 }
 0x10d   :  { %v578_v6 = vmul.f32 %v1638_v4, %v576_v62  ;;  %vm583_vm7 = vweird.f32 %v1638_v4  ;;  %v844_v15 = vmul.u32 2221713035, %v843_v12 }
 0x10e   :  { %991 = vmatpush.bf16.msrb.mxu3 %v1888_v3  ;;  %vm584_vm9 = vmor %vm582_vm8, %vm583_vm7 }
 0x10f   :  { %v579_v9 = vsub.f32 1.0, %v578_v6 }
 0x111   :  { %v580_v13 = vmul.f32 %v1638_v4, %v579_v9 }
 0x113   :  { %v581_v17 = vadd.f32 %v1638_v4, %v580_v13 }
 0x115   :  { %v585_v19 = vsel %vm584_vm9, %v1638_v4, %v581_v17 }
 0x116   :  { %v590_v21 = vsel %vm587_vm10, %v589_v18, %v585_v19  ;;  %v845_v18 = vshrl.u32 %v844_v15, 16 }
 0x117   :  { %v608_v23 = vmul.f32 16777216.0, %v590_v21 }
 0x118   :  { %v846_v19 = vxor.u32 %v845_v18, %v844_v15 }
 0x119   :  { %vm609_vm11 = vcmp.lt.f32.partialorder %v607_v20, %v608_v23  ;;  %v1952_v23 = vld [vmem:[%s2196_s5 + $0x38] sm:$0xff] }
 0x11a   :  { %v1537_v24 = vsel %vm609_vm11, 1.0, %v1782_v40  ;;  %vm1538_vm12 = vmpackc.low %vm609_vm11, %vm609_vm11  ;;  %v847_v22 = vshrl.u32 %v846_v19, 8  ;;  %553 = vmatpush.bf16.msra.mxu2 %v1952_v23  ;;  %673 = vmatpush.bf16.msra.mxu1 %v1952_v23 }
 0x11b   :  { %v612_v26 = vsub.f32 1.0, %v1537_v24  ;;  %1539 = vmatmul.msk.bf16.vlgmr.msra.gmra.mxu0 %vm1538_vm12, %v1783_v46 }
 0x11c   :  { %1107 = vmatpush.bf16.msra.mxu0 %v1834_v42  ;;  %v848_v24 = vshrl.u32 %v847_v22, 16 }
 0x11d   :  { %v613_v27 = vmul.f32 %v612_v26, %v571_v53  ;;  %v479_v26 = vxor.u32 1168127867, %v1843_v47 }
 0x11e   :  { %554 = vmatpush.bf16.msra.mxu2 %v1960_v25  ;;  %674 = vmatpush.bf16.msra.mxu1 %v1960_v25 }
 0x11f   :  { %v693_v29 = vmul.f32 0.8187308, %v613_v27  ;;  %v961_v27 = vxor.u32 2569309066, %v1843_v47 }
 0x120   :  { %1108 = vmatpush.bf16.msra.mxu0 %v1840_v45 }
 0x121   :  { %v694_v30 = vadd.f32 %v693_v29, %v1895_v10  ;;  %v849_v29 = vand.u32 65535, %v847_v22  ;;  %v962_v34 = vshrl.u32 %v961_v27, 16 }
 0x122   :  { %555 = vmatpush.bf16.msra.mxu2 %v1970_v31  ;;  %675 = vmatpush.bf16.msra.mxu1 %v1970_v31 }
 0x123   :  { %v1545_v32 = vadd.f32 -1.0, %v694_v30  ;;  %v852_v38 = vcvt.s32.f32 %v849_v29 }
 0x124   :  { %1109 = vmatpush.bf16.msra.mxu0 %v1849_v48 }
 0x125   :  { %v1546_v33 = vmul.f32 -1.442695, %v1545_v32 }
 0x126   :  { %556 = vmatpush.bf16.msra.mxu2 %v1978_v39  ;;  %676 = vmatpush.bf16.msra.mxu1 %v1978_v39 }
 0x127   :  { %1639 = vpow2.f32 %v1546_v33  ;;  %v480_v33 = vshrl.u32 %v479_v26, 16 }
 0x128   :  { %1110 = vmatpush.bf16.msra.mxu0 %v1860_v52 }
 0x129   :  { %v481_v44 = vxor.u32 %v480_v33, %v479_v26 }
 0x12c   :  { %1111 = vmatpush.bf16.msra.mxu0 %v1867_v56 }
 0x12d   :  { %v1640_v36 = vpop.eup %1639 }
 0x12e   :  { %v699_v37 = vadd.f32 1.0, %v1640_v36 }
 0x130   :  { %1641 = vrcp.f32 %v699_v37  ;;  %1112 = vmatpush.bf16.msra.mxu0 %v1874_v60  ;;  %v711_v54 = vand.u32 2147483648, %v699_v37  ;;  %v709_v58 = vand.u32 2147483647, %v699_v37  ;;  %vm705_vm14 = vweird.f32 %v699_v37 }
 0x132   :  { %v712_v63 = vor.u32 1.1754944e-38, %v711_v54  ;;  %vm710_vm0 = vcmp.eq.f32.partialorder %v709_v58, 8.507059e+37 }
 0x134   :  { %1113 = vmatpush.bf16.msra.mxu0 %v1881_v0 }
 0x136   :  { %v1642_v43 = vpop.eup %1641 }
 0x137   :  { %v701_v49 = vmul.f32 %v1642_v43, %v699_v37  ;;  %vm706_vm13 = vweird.f32 %v1642_v43 }
 0x138   :  { %1114 = vmatpush.bf16.msra.mxu0 %v1888_v3  ;;  %vm707_vm15 = vmor %vm705_vm14, %vm706_vm13 }
 0x139   :  { %v702_v53 = vsub.f32 1.0, %v701_v49  ;;  %v963_v49 = vxor.u32 %v962_v34, %v961_v27  ;;  %v650_v34 = vxor.u32 2182032109, %v1843_v47 }
 0x13b   :  { %v703_v57 = vmul.f32 %v1642_v43, %v702_v53  ;;  %v1985_v53 = vld [vmem:[%s2196_s5 + $0x18] sm:$0xff]  ;;  %v964_v59 = vmul.u32 2146121005, %v963_v49 }
 0x13c   :  { %557 = vmatpush.bf16.msra.mxu2 %v1985_v53  ;;  %677 = vmatpush.bf16.msra.mxu1 %v1985_v53 }
 0x13d   :  { %v704_v62 = vadd.f32 %v1642_v43, %v703_v57  ;;  %v482_v57 = vmul.u32 2146121005, %v481_v44  ;;  %v651_v44 = vshrl.u32 %v650_v34, 16 }
 0x13f   :  { %v708_v1 = vsel %vm707_vm15, %v1642_v43, %v704_v62  ;;  %v1992_v62 = vld [vmem:[%s2196_s5 + $0x10] sm:$0xff] }
 0x140   :  { %v713_v4 = vsel %vm710_vm0, %v712_v63, %v708_v1  ;;  %v483_v63 = vshrl.u32 %v482_v57, 15  ;;  %558 = vmatpush.bf16.msra.mxu2 %v1992_v62  ;;  %678 = vmatpush.bf16.msra.mxu1 %v1992_v62 }
 0x141   :  { %v731_v6 = vmul.f32 16777216.0, %v713_v4 }
 0x142   :  { %v484_v8 = vxor.u32 %v483_v63, %v482_v57 }
 0x143   :  { %vm732_vm1 = vcmp.lt.f32.partialorder %v730_v2, %v731_v6  ;;  %v965_v2 = vshrl.u32 %v964_v59, 15 }
 0x144   :  { %v1547_v7 = vsel %vm732_vm1, 1.0, %v1782_v40  ;;  %vm1548_vm2 = vmpackc.low %vm732_vm1, %vm732_vm1  ;;  %559 = vmatpush.bf16.msra.mxu2 %v2001_v5  ;;  %679 = vmatpush.bf16.msra.mxu1 %v2001_v5 }
 0x145   :  { %v735_v9 = vsub.f32 1.0, %v1547_v7  ;;  %1549 = vmatmul.msk.bf16.vlgmr.msra.gmra.mxu3 %vm1548_vm2, %v1783_v46  ;;  %v2008_v7 = vld [vmem:[%s2195_s4] ss:$0 sm:$0xff] }
 0x146   :  { %1230 = vmatpush.bf16.msra.mxu3 %v1834_v42 }
 0x147   :  { %v736_v11 = vmul.f32 %v735_v9, %v694_v30  ;;  %v850_v30 = vcvt.s32.f32 %v848_v24  ;;  %v966_v9 = vxor.u32 %v965_v2, %v964_v59 }
 0x149   :  { %v816_v13 = vmul.f32 0.8187308, %v736_v11  ;;  %v851_v37 = vmul.f32 65536.0, %v850_v30 }
 0x14a   :  { %1231 = vmatpush.bf16.msra.mxu3 %v1840_v45 }
 0x14b   :  { %v1943_v14 = vadd.f32 %v816_v13, %v1895_v10  ;;  %v853_v55 = vadd.f32 %v852_v38, %v851_v37  ;;  %v2015_v13 = vld [vmem:[%s2196_s5] sm:$0xff] }
 0x14c   :  { %560 = vmatpush.bf16.msra.mxu2 %v2015_v13  ;;  %680 = vmatpush.bf16.msra.mxu1 %v2015_v13 }
 0x14d   :  { %v1555_v16 = vadd.f32 -1.0, %v1943_v14 }
 0x14e   :  { %1232 = vmatpush.bf16.msra.mxu3 %v1849_v48 }
 0x14f   :  { %v1556_v17 = vmul.f32 -1.442695, %v1555_v16  ;;  %v967_v16 = vmul.u32 2221713035, %v966_v9 }
 0x150   :  { %796 = vmatpush.bf16.msrb.mxu2 %v1952_v23  ;;  %919 = vmatpush.bf16.msrb.mxu1 %v1952_v23 }
 0x151   :  { %1643 = vpow2.f32 %v1556_v17 }
 0x152   :  { %1233 = vmatpush.bf16.msra.mxu3 %v1860_v52 }
 0x154   :  { %797 = vmatpush.bf16.msrb.mxu2 %v1960_v25  ;;  %920 = vmatpush.bf16.msrb.mxu1 %v1960_v25 }
 0x156   :  { %1234 = vmatpush.bf16.msra.mxu3 %v1867_v56 }
 0x157   :  { %v1644_v20 = vpop.eup %1643 }
 0x158   :  { %v822_v21 = vadd.f32 1.0, %v1644_v20  ;;  %798 = vmatpush.bf16.msrb.mxu2 %v1970_v31  ;;  %921 = vmatpush.bf16.msrb.mxu1 %v1970_v31 }
 0x15a   :  { %1645 = vrcp.f32 %v822_v21  ;;  %1235 = vmatpush.bf16.msra.mxu3 %v1874_v60  ;;  %v834_v36 = vand.u32 2147483648, %v822_v21  ;;  %v832_v43 = vand.u32 2147483647, %v822_v21  ;;  %vm828_vm4 = vweird.f32 %v822_v21 }
 0x15c   :  { %v835_v51 = vor.u32 1.1754944e-38, %v834_v36  ;;  %vm833_vm6 = vcmp.eq.f32.partialorder %v832_v43, 8.507059e+37  ;;  %799 = vmatpush.bf16.msrb.mxu2 %v1978_v39  ;;  %922 = vmatpush.bf16.msrb.mxu1 %v1978_v39 }
 0x15e   :  { %1236 = vmatpush.bf16.msra.mxu3 %v1881_v0 }
 0x160   :  { %v1646_v28 = vpop.eup %1645  ;;  %800 = vmatpush.bf16.msrb.mxu2 %v1985_v53  ;;  %923 = vmatpush.bf16.msrb.mxu1 %v1985_v53 }
 0x161   :  { %v824_v32 = vmul.f32 %v1646_v28, %v822_v21  ;;  %vm829_vm3 = vweird.f32 %v1646_v28  ;;  %v968_v21 = vshrl.u32 %v967_v16, 16 }
 0x162   :  { %1237 = vmatpush.bf16.msra.mxu3 %v1888_v3  ;;  %vm830_vm5 = vmor %vm828_vm4, %vm829_vm3 }
 0x163   :  { %v825_v35 = vsub.f32 1.0, %v824_v32  ;;  %v969_v26 = vxor.u32 %v968_v21, %v967_v16 }
 0x164   :  { %801 = vmatpush.bf16.msrb.mxu2 %v1992_v62  ;;  %924 = vmatpush.bf16.msrb.mxu1 %v1992_v62 }
 0x165   :  { %v826_v41 = vmul.f32 %v1646_v28, %v825_v35  ;;  %v970_v30 = vshrl.u32 %v969_v26, 8 }
 0x167   :  { %v827_v50 = vadd.f32 %v1646_v28, %v826_v41  ;;  %v971_v33 = vshrl.u32 %v970_v30, 16  ;;  %v972_v37 = vand.u32 65535, %v970_v30 }
 0x168   :  { %802 = vmatpush.bf16.msrb.mxu2 %v2001_v5  ;;  %925 = vmatpush.bf16.msrb.mxu1 %v2001_v5 }
 0x169   :  { %v831_v54 = vsel %vm830_vm5, %v1646_v28, %v827_v50  ;;  %v973_v41 = vcvt.s32.f32 %v971_v33 }
 0x16a   :  { %v836_v58 = vsel %vm833_vm6, %v835_v51, %v831_v54 }
 0x16b   :  { %v854_v61 = vmul.f32 16777216.0, %v836_v58 }
 0x16c   :  { %803 = vmatpush.bf16.msrb.mxu2 %v2015_v13  ;;  %926 = vmatpush.bf16.msrb.mxu1 %v2015_v13 }
 0x16d   :  { %vm855_vm7 = vcmp.lt.f32.partialorder %v853_v55, %v854_v61  ;;  %v974_v61 = vmul.f32 65536.0, %v973_v41 }
 0x16e   :  { %v1557_v1 = vsel %vm855_vm7, 1.0, %v1782_v40  ;;  %vm1558_vm8 = vmpackc.low %vm855_vm7, %vm855_vm7 }
 0x16f   :  { %v858_v4 = vsub.f32 1.0, %v1557_v1  ;;  %1559 = vmatmul.msk.bf16.vlgmr.msrb.gmra.mxu0 %vm1558_vm8, %v1783_v46  ;;  %v652_v1 = vxor.u32 %v651_v44, %v650_v34 }
 0x170   :  { %1351 = vmatpush.bf16.msrb.mxu0 %v1834_v42 }
 0x171   :  { %v859_v6 = vmul.f32 %v858_v4, %v1943_v14  ;;  %v485_v14 = vmul.u32 2221713035, %v484_v8 }
 0x173   :  { %v939_v11 = vmul.f32 0.8187308, %v859_v6  ;;  %v486_v19 = vshrl.u32 %v485_v14, 16 }
 0x174   :  { %v454_v12 = vpop.f32.mrf.mxu3  ;;  %1352 = vmatpush.bf16.msrb.mxu0 %v1840_v45 }
 0x175   :  { %v2019_v42 = vadd.f32 %v2008_v7, %v454_v12  ;;  %v2022_v15 = vadd.f32 %v939_v11, %v1895_v10  ;;  %v487_v24 = vxor.u32 %v486_v19, %v485_v14 }
 0x177   :  { %v1498_v17 = vadd.f32 -1.0, %v2019_v42  ;;  %v1565_v18 = vadd.f32 -1.0, %v2022_v15  ;;  %v488_v27 = vshrl.u32 %v487_v24, 8 }
 0x178   :  { %1353 = vmatpush.bf16.msrb.mxu0 %v1849_v48 }
 0x179   :  { %v1499_v45 = vmul.f32 -1.442695, %v1498_v17  ;;  %v1566_v20 = vmul.f32 -1.442695, %v1565_v18  ;;  %v490_v35 = vand.u32 65535, %v488_v27 }
 0x17a   :  { %v653_v17 = vmul.u32 2146121005, %v652_v1 }
 0x17b   :  { %1647 = vpow2.f32 %v1499_v45  ;;  %v493_v55 = vcvt.s32.f32 %v490_v35 }
 0x17c   :  { %v456_v22 = vpop.f32.mrf.mxu3  ;;  %1649 = vpow2.f32 %v1566_v20  ;;  %1354 = vmatpush.bf16.msrb.mxu0 %v1860_v52  ;;  %v489_v52 = vshrl.u32 %v488_v27, 16  ;;  %v654_v26 = vshrl.u32 %v653_v17, 15 }
 0x17e   :  { %v491_v36 = vcvt.s32.f32 %v489_v52  ;;  %v655_v33 = vxor.u32 %v654_v26, %v653_v17 }
 0x180   :  { %1355 = vmatpush.bf16.msrb.mxu0 %v1867_v56  ;;  %v1084_v56 = vxor.u32 3583213308, %v1843_v47  ;;  %v492_v54 = vmul.f32 65536.0, %v491_v36  ;;  %v656_v41 = vmul.u32 2221713035, %v655_v33 }
 0x181   :  { %v1648_v48 = vpop.eup %1647 }
 0x182   :  { %v1650_v28 = vpop.eup %1649  ;;  %v463_v29 = vadd.f32 1.0, %v1648_v48  ;;  %v1085_v50 = vshrl.u32 %v1084_v56, 16  ;;  %v494_v9 = vadd.f32 %v493_v55, %v492_v54 }
 0x183   :  { %v945_v32 = vadd.f32 1.0, %v1650_v28 }
 0x184   :  { %1651 = vrcp.f32 %v463_v29  ;;  %1356 = vmatpush.bf16.msrb.mxu0 %v1874_v60  ;;  %v473_v57 = vand.u32 2147483647, %v463_v29  ;;  %v475_v58 = vand.u32 2147483648, %v463_v29  ;;  %vm469_vm11 = vweird.f32 %v463_v29 }
 0x185   :  { %1653 = vrcp.f32 %v945_v32  ;;  %v957_v2 = vand.u32 2147483648, %v945_v32  ;;  %v955_v6 = vand.u32 2147483647, %v945_v32  ;;  %vm951_vm13 = vweird.f32 %v945_v32 }
 0x186   :  { %v476_v11 = vor.u32 1.1754944e-38, %v475_v58  ;;  %vm474_vm14 = vcmp.eq.f32.partialorder %v473_v57, 8.507059e+37 }
 0x187   :  { %v958_v18 = vor.u32 1.1754944e-38, %v957_v2  ;;  %vm956_vm0 = vcmp.eq.f32.partialorder %v955_v6, 8.507059e+37  ;;  %v1207_v6 = vxor.u32 302150254, %v1843_v47 }
 0x188   :  { %1357 = vmatpush.bf16.msrb.mxu0 %v1881_v0  ;;  %v975_v0 = vcvt.s32.f32 %v972_v37 }
 0x18a   :  { %v1652_v38 = vpop.eup %1651  ;;  %v976_v14 = vadd.f32 %v975_v0, %v974_v61 }
 0x18b   :  { %v1654_v43 = vpop.eup %1653  ;;  %v465_v60 = vmul.f32 %v1652_v38, %v463_v29  ;;  %vm470_vm9 = vweird.f32 %v1652_v38 }
 0x18c   :  { %v947_v49 = vmul.f32 %v1654_v43, %v945_v32  ;;  %1358 = vmatpush.bf16.msrb.mxu0 %v1888_v3  ;;  %vm952_vm10 = vweird.f32 %v1654_v43  ;;  %v1086_v3 = vxor.u32 %v1085_v50, %v1084_v56  ;;  %vm471_vm12 = vmor %vm469_vm11, %vm470_vm9  ;;  %v657_v50 = vshrl.u32 %v656_v41, 16 }
 0x18d   :  { %v466_v51 = vsub.f32 1.0, %v465_v60  ;;  %vm953_vm15 = vmor %vm951_vm13, %vm952_vm10 }
 0x18e   :  { %v948_v59 = vsub.f32 1.0, %v947_v49  ;;  %v1087_v20 = vmul.u32 2146121005, %v1086_v3  ;;  %v658_v55 = vxor.u32 %v657_v50, %v656_v41 }
 0x18f   :  { %v467_v63 = vmul.f32 %v1652_v38, %v466_v51 }
 0x190   :  { %v949_v4 = vmul.f32 %v1654_v43, %v948_v59  ;;  %v1088_v28 = vshrl.u32 %v1087_v20, 15  ;;  %v659_v58 = vshrl.u32 %v658_v55, 8 }
 0x191   :  { %v468_v8 = vadd.f32 %v1652_v38, %v467_v63 }
 0x192   :  { %v950_v12 = vadd.f32 %v1654_v43, %v949_v4  ;;  %v1089_v56 = vxor.u32 %v1088_v28, %v1087_v20  ;;  %v660_v2 = vshrl.u32 %v659_v58, 16  ;;  %v661_v3 = vand.u32 65535, %v659_v58 }
 0x193   :  { %v472_v16 = vsel %vm471_vm12, %v1652_v38, %v468_v8 }
 0x194   :  { %v477_v45 = vsel %vm474_vm14, %v476_v11, %v472_v16  ;;  %v954_v19 = vsel %vm953_vm15, %v1654_v43, %v950_v12  ;;  %v1090_v44 = vmul.u32 2221713035, %v1089_v56  ;;  %v662_v8 = vcvt.s32.f32 %v660_v2 }
 0x195   :  { %v495_v21 = vmul.f32 16777216.0, %v477_v45  ;;  %v959_v22 = vsel %vm956_vm0, %v958_v18, %v954_v19  ;;  %v773_v11 = vxor.u32 3195936351, %v1843_v47  ;;  %v1208_v19 = vshrl.u32 %v1207_v6, 16 }
 0x196   :  { %v977_v24 = vmul.f32 16777216.0, %v959_v22  ;;  %v1091_v54 = vshrl.u32 %v1090_v44, 16  ;;  %v664_v22 = vcvt.s32.f32 %v661_v3 }
 0x197   :  { %vm496_vm1 = vcmp.lt.f32.partialorder %v494_v9, %v495_v21  ;;  %v774_v45 = vshrl.u32 %v773_v11, 16  ;;  %v663_v21 = vmul.f32 65536.0, %v662_v8 }
 0x198   :  { %v1500_v48 = vsel %vm496_vm1, 1.0, %v1782_v40  ;;  %v624_v27 = vpop.f32.mrf.mxu0  ;;  %vm1533_vm2 = vmpackc.low %vm496_vm1, %vm496_vm1  ;;  %vm978_vm3 = vcmp.lt.f32.partialorder %v976_v14, %v977_v24  ;;  %v1092_v0 = vxor.u32 %v1091_v54, %v1090_v44 }
 0x199   :  { %v499_v29 = vsub.f32 1.0, %v1500_v48  ;;  %1534 = vmatmul.msk.bf16.vlgmr.msra.gmra.mxu2 %vm1533_vm2, %v1783_v46  ;;  %v1567_v30 = vsel %vm978_vm3, 1.0, %v1782_v40  ;;  %vm1568_vm4 = vmpackc.low %vm978_vm3, %vm978_vm3  ;;  %v625_v36 = vadd.f32 %v2008_v7, %v624_v27  ;;  %v775_v33 = vxor.u32 %v774_v45, %v773_v11 }
 0x19a   :  { %v981_v32 = vsub.f32 1.0, %v1567_v30  ;;  %1569 = vmatmul.msk.bf16.vlgmr.msrb.gmra.mxu3 %vm1568_vm4, %v1783_v46  ;;  %1042 = vmatpush.bf16.msra.mxu2 %v1952_v23  ;;  %v1093_v63 = vshrl.u32 %v1092_v0, 8 }
 0x19b   :  { %v500_v52 = vmul.f32 %v499_v29, %v2019_v42 }
 0x19c   :  { %v982_v34 = vmul.f32 %v981_v32, %v2022_v15  ;;  %v1094_v4 = vshrl.u32 %v1093_v63, 16  ;;  %v1095_v9 = vand.u32 65535, %v1093_v63 }
 0x19d   :  { %v628_v35 = vmul.f32 0.8187308, %v500_v52 }
 0x19e   :  { %v1062_v37 = vmul.f32 0.8187308, %v982_v34  ;;  %1043 = vmatpush.bf16.msra.mxu2 %v1960_v25  ;;  %v1096_v14 = vcvt.s32.f32 %v1094_v4  ;;  %v1098_v24 = vcvt.s32.f32 %v1095_v9  ;;  %v1209_v34 = vxor.u32 %v1208_v19, %v1207_v6 }
 0x19f   :  { %v2061_v38 = vadd.f32 %v628_v35, %v625_v36  ;;  %v665_v35 = vadd.f32 %v664_v22, %v663_v21 }
 0x1a0   :  { %v626_v43 = vpop.f32.mrf.mxu0  ;;  %v2064_v60 = vadd.f32 %v1062_v37, %v1895_v10  ;;  %v1097_v28 = vmul.f32 65536.0, %v1096_v14  ;;  %v1210_v50 = vmul.u32 2146121005, %v1209_v34  ;;  %v896_v34 = vxor.u32 4209840593, %v1843_v47 }
 0x1a1   :  { %v1540_v42 = vadd.f32 -1.0, %v2061_v38 }
 0x1a2   :  { %v1575_v49 = vadd.f32 -1.0, %v2064_v60  ;;  %1044 = vmatpush.bf16.msra.mxu2 %v1970_v31  ;;  %v1099_v41 = vadd.f32 %v1098_v24, %v1097_v28  ;;  %v1211_v58 = vshrl.u32 %v1210_v50, 15 }
 0x1a3   :  { %v1541_v15 = vmul.f32 -1.442695, %v1540_v42 }
 0x1a4   :  { %v1576_v51 = vmul.f32 -1.442695, %v1575_v49  ;;  %v1212_v6 = vxor.u32 %v1211_v58, %v1210_v50 }
 0x1a5   :  { %1655 = vpow2.f32 %v1541_v15  ;;  %v776_v15 = vmul.u32 2146121005, %v775_v33  ;;  %v1330_v33 = vxor.u32 1316054496, %v1843_v47 }
 0x1a6   :  { %1657 = vpow2.f32 %v1576_v51  ;;  %1045 = vmatpush.bf16.msra.mxu2 %v1978_v39 }
 0x1aa   :  { %1046 = vmatpush.bf16.msra.mxu2 %v1985_v53 }
 0x1ab   :  { %v1656_v57 = vpop.eup %1655 }
 0x1ac   :  { %v1658_v59 = vpop.eup %1657  ;;  %v634_v61 = vadd.f32 1.0, %v1656_v57  ;;  %v777_v57 = vshrl.u32 %v776_v15, 15 }
 0x1ad   :  { %v1068_v1 = vadd.f32 1.0, %v1658_v59 }
 0x1ae   :  { %1659 = vrcp.f32 %v634_v61  ;;  %1047 = vmatpush.bf16.msra.mxu2 %v1992_v62  ;;  %v644_v26 = vand.u32 2147483647, %v634_v61  ;;  %v646_v48 = vand.u32 2147483648, %v634_v61  ;;  %vm640_vm7 = vweird.f32 %v634_v61 }
 0x1af   :  { %1661 = vrcp.f32 %v1068_v1  ;;  %v1078_v30 = vand.u32 2147483647, %v1068_v1  ;;  %v1080_v32 = vand.u32 2147483648, %v1068_v1  ;;  %vm1074_vm9 = vweird.f32 %v1068_v1 }
 0x1b0   :  { %v647_v36 = vor.u32 1.1754944e-38, %v646_v48  ;;  %vm645_vm10 = vcmp.eq.f32.partialorder %v644_v26, 8.507059e+37  ;;  %v778_v4 = vxor.u32 %v777_v57, %v776_v15  ;;  %v897_v15 = vshrl.u32 %v896_v34, 16 }
 0x1b1   :  { %vm1079_vm12 = vcmp.eq.f32.partialorder %v1078_v30, 8.507059e+37  ;;  %v1081_v44 = vor.u32 1.1754944e-38, %v1080_v32 }
 0x1b2   :  { %1048 = vmatpush.bf16.msra.mxu2 %v2001_v5 }
 0x1b4   :  { %v1660_v12 = vpop.eup %1659 }
 0x1b5   :  { %v1662_v16 = vpop.eup %1661  ;;  %v636_v17 = vmul.f32 %v1660_v12, %v634_v61  ;;  %vm641_vm5 = vweird.f32 %v1660_v12 }
 0x1b6   :  { %v1070_v18 = vmul.f32 %v1662_v16, %v1068_v1  ;;  %1049 = vmatpush.bf16.msra.mxu2 %v2015_v13  ;;  %vm1075_vm6 = vweird.f32 %v1662_v16  ;;  %vm642_vm8 = vmor %vm640_vm7, %vm641_vm5 }
 0x1b7   :  { %v637_v20 = vsub.f32 1.0, %v636_v17  ;;  %vm1076_vm11 = vmor %vm1074_vm9, %vm1075_vm6 }
 0x1b8   :  { %v1071_v27 = vsub.f32 1.0, %v1070_v18 }
 0x1b9   :  { %v638_v29 = vmul.f32 %v1660_v12, %v637_v20 }
 0x1ba   :  { %v1072_v52 = vmul.f32 %v1662_v16, %v1071_v27 }
 0x1bb   :  { %v639_v56 = vadd.f32 %v1660_v12, %v638_v29 }
 0x1bc   :  { %v1073_v37 = vadd.f32 %v1662_v16, %v1072_v52 }
 0x1bd   :  { %v643_v43 = vsel %vm642_vm8, %v1660_v12, %v639_v56  ;;  %v779_v12 = vmul.u32 2221713035, %v778_v4 }
 0x1be   :  { %v648_v42 = vsel %vm645_vm10, %v647_v36, %v643_v43  ;;  %v1077_v49 = vsel %vm1076_vm11, %v1662_v16, %v1073_v37  ;;  %v1213_v16 = vmul.u32 2221713035, %v1212_v6  ;;  %v898_v6 = vxor.u32 %v897_v15, %v896_v34 }
 0x1bf   :  { %v666_v51 = vmul.f32 16777216.0, %v648_v42  ;;  %v1082_v54 = vsel %vm1079_vm12, %v1081_v44, %v1077_v49  ;;  %v780_v18 = vshrl.u32 %v779_v12, 16  ;;  %v1331_v42 = vshrl.u32 %v1330_v33, 16 }
 0x1c0   :  { %v1100_v55 = vmul.f32 16777216.0, %v1082_v54  ;;  %v1214_v19 = vshrl.u32 %v1213_v16, 16 }
 0x1c1   :  { %vm667_vm13 = vcmp.lt.f32.partialorder %v665_v35, %v666_v51  ;;  %v781_v22 = vxor.u32 %v780_v18, %v779_v12 }
 0x1c2   :  { %v1542_v0 = vsel %vm667_vm13, 1.0, %v1782_v40  ;;  %vm1543_vm14 = vmpackc.low %vm667_vm13, %vm667_vm13  ;;  %vm1101_vm15 = vcmp.lt.f32.partialorder %v1099_v41, %v1100_v55  ;;  %v1215_v24 = vxor.u32 %v1214_v19, %v1213_v16 }
 0x1c3   :  { %v670_v59 = vsub.f32 1.0, %v1542_v0  ;;  %1544 = vmatmul.msk.bf16.vlgmr.msra.gmra.mxu1 %vm1543_vm14, %v1783_v46  ;;  %v1577_v61 = vsel %vm1101_vm15, 1.0, %v1782_v40  ;;  %vm1578_vm0 = vmpackc.low %vm1101_vm15, %vm1101_vm15  ;;  %v782_v48 = vshrl.u32 %v781_v22, 8 }
 0x1c4   :  { %v1104_v63 = vsub.f32 1.0, %v1577_v61  ;;  %1579 = vmatmul.msk.bf16.vlgmr.msra.gmra.mxu0 %vm1578_vm0, %v1783_v46  ;;  %1165 = vmatpush.bf16.msra.mxu1 %v1952_v23  ;;  %v1216_v27 = vshrl.u32 %v1215_v24, 8 }
 0x1c5   :  { %v671_v1 = vmul.f32 %v670_v59, %v2061_v38  ;;  %v783_v32 = vshrl.u32 %v782_v48, 16  ;;  %v784_v41 = vand.u32 65535, %v782_v48 }
 0x1c6   :  { %v1105_v2 = vmul.f32 %v1104_v63, %v2064_v60  ;;  %v1217_v52 = vshrl.u32 %v1216_v27, 16  ;;  %v1218_v35 = vand.u32 65535, %v1216_v27 }
 0x1c7   :  { %v751_v11 = vmul.f32 0.8187308, %v671_v1  ;;  %v785_v56 = vcvt.s32.f32 %v783_v32  ;;  %v787_v57 = vcvt.s32.f32 %v784_v41  ;;  %v1332_v1 = vxor.u32 %v1331_v42, %v1330_v33 }
 0x1c8   :  { %v1185_v3 = vmul.f32 0.8187308, %v1105_v2  ;;  %v747_v8 = vpop.f32.mrf.mxu3  ;;  %1166 = vmatpush.bf16.msra.mxu1 %v1960_v25  ;;  %v1219_v36 = vcvt.s32.f32 %v1217_v52  ;;  %v1221_v55 = vcvt.s32.f32 %v1218_v35 }
 0x1c9   :  { %v748_v9 = vadd.f32 %v2008_v7, %v747_v8  ;;  %v786_v50 = vmul.f32 65536.0, %v785_v56 }
 0x1ca   :  { %v2086_v14 = vadd.f32 %v1185_v3, %v1895_v10  ;;  %v1220_v54 = vmul.f32 65536.0, %v1219_v36 }
 0x1cb   :  { %v2088_v17 = vadd.f32 %v751_v11, %v748_v9  ;;  %v788_v11 = vadd.f32 %v787_v57, %v786_v50 }
 0x1cc   :  { %v1585_v38 = vadd.f32 -1.0, %v2086_v14  ;;  %1167 = vmatpush.bf16.msra.mxu1 %v1970_v31  ;;  %v1222_v8 = vadd.f32 %v1221_v55, %v1220_v54 }
 0x1cd   :  { %v1550_v60 = vadd.f32 -1.0, %v2088_v17 }
 0x1ce   :  { %v1586_v45 = vmul.f32 -1.442695, %v1585_v38 }
 0x1cf   :  { %v1551_v20 = vmul.f32 -1.442695, %v1550_v60  ;;  %v1333_v60 = vmul.u32 2146121005, %v1332_v1 }
 0x1d0   :  { %v749_v21 = vpop.f32.mrf.mxu3  ;;  %1663 = vpow2.f32 %v1586_v45  ;;  %1168 = vmatpush.bf16.msra.mxu1 %v1978_v39  ;;  %v899_v45 = vmul.u32 2146121005, %v898_v6 }
 0x1d1   :  { %1665 = vpow2.f32 %v1551_v20 }
 0x1d2   :  { %v900_v48 = vshrl.u32 %v899_v45, 15 }
 0x1d4   :  { %1169 = vmatpush.bf16.msra.mxu1 %v1985_v53  ;;  %v901_v34 = vxor.u32 %v900_v48, %v899_v45 }
 0x1d6   :  { %v1664_v26 = vpop.eup %1663  ;;  %v902_v42 = vmul.u32 2221713035, %v901_v34 }
 0x1d7   :  { %v1666_v28 = vpop.eup %1665  ;;  %v1191_v29 = vadd.f32 1.0, %v1664_v26  ;;  %v1334_v26 = vshrl.u32 %v1333_v60, 15 }
 0x1d8   :  { %v757_v30 = vadd.f32 1.0, %v1666_v28  ;;  %1170 = vmatpush.bf16.msra.mxu1 %v1992_v62 }
 0x1d9   :  { %1667 = vrcp.f32 %v1191_v29  ;;  %v1201_v58 = vand.u32 2147483647, %v1191_v29  ;;  %v1203_v59 = vand.u32 2147483648, %v1191_v29  ;;  %vm1197_vm3 = vweird.f32 %v1191_v29 }
 0x1da   :  { %1669 = vrcp.f32 %v757_v30  ;;  %v769_v61 = vand.u32 2147483648, %v757_v30  ;;  %v767_v4 = vand.u32 2147483647, %v757_v30  ;;  %vm763_vm4 = vweird.f32 %v757_v30 }
 0x1db   :  { %v1204_v12 = vor.u32 1.1754944e-38, %v1203_v59  ;;  %vm1202_vm7 = vcmp.eq.f32.partialorder %v1201_v58, 8.507059e+37  ;;  %v1335_v52 = vxor.u32 %v1334_v26, %v1333_v60 }
 0x1dc   :  { %1171 = vmatpush.bf16.msra.mxu1 %v2001_v5  ;;  %v770_v16 = vor.u32 1.1754944e-38, %v769_v61  ;;  %vm768_vm8 = vcmp.eq.f32.partialorder %v767_v4, 8.507059e+37 }
 0x1df   :  { %v1668_v37 = vpop.eup %1667 }
 0x1e0   :  { %v1670_v43 = vpop.eup %1669  ;;  %v1193_v44 = vmul.f32 %v1668_v37, %v1191_v29  ;;  %1172 = vmatpush.bf16.msra.mxu1 %v2015_v13  ;;  %vm1198_vm1 = vweird.f32 %v1668_v37 }
 0x1e1   :  { %v759_v49 = vmul.f32 %v1670_v43, %v757_v30  ;;  %vm764_vm2 = vweird.f32 %v1670_v43  ;;  %vm1199_vm5 = vmor %vm1197_vm3, %vm1198_vm1 }
 0x1e2   :  { %v1194_v51 = vsub.f32 1.0, %v1193_v44  ;;  %vm765_vm6 = vmor %vm763_vm4, %vm764_vm2 }
 0x1e3   :  { %v760_v0 = vsub.f32 1.0, %v759_v49 }
 0x1e4   :  { %v1195_v63 = vmul.f32 %v1668_v37, %v1194_v51  ;;  %v903_v51 = vshrl.u32 %v902_v42, 16 }
 0x1e5   :  { %v761_v2 = vmul.f32 %v1670_v43, %v760_v0 }
 0x1e6   :  { %v1196_v3 = vadd.f32 %v1668_v37, %v1195_v63 }
 0x1e7   :  { %v762_v9 = vadd.f32 %v1670_v43, %v761_v2 }
 0x1e8   :  { %v1200_v38 = vsel %vm1199_vm5, %v1668_v37, %v1196_v3 }
 0x1e9   :  { %v766_v18 = vsel %vm765_vm6, %v1670_v43, %v762_v9  ;;  %v1205_v19 = vsel %vm1202_vm7, %v1204_v12, %v1200_v38  ;;  %v1336_v43 = vmul.u32 2221713035, %v1335_v52 }
 0x1ea   :  { %v771_v20 = vsel %vm768_vm8, %v770_v16, %v766_v18  ;;  %v1223_v21 = vmul.f32 16777216.0, %v1205_v19 }
 0x1eb   :  { %v789_v22 = vmul.f32 16777216.0, %v771_v20  ;;  %v1337_v50 = vshrl.u32 %v1336_v43, 16 }
 0x1ec   :  { %v870_v24 = vpop.f32.mrf.mxu0  ;;  %vm1224_vm9 = vcmp.lt.f32.partialorder %v1222_v8, %v1223_v21  ;;  %v1019_v8 = vxor.u32 928777539, %v1843_v47 }
 0x1ed   :  { %vm790_vm10 = vcmp.lt.f32.partialorder %v788_v11, %v789_v22  ;;  %v1587_v27 = vsel %vm1224_vm9, 1.0, %v1782_v40  ;;  %vm1588_vm11 = vmpackc.low %vm1224_vm9, %vm1224_vm9  ;;  %v871_v35 = vadd.f32 %v2008_v7, %v870_v24  ;;  %v1338_v54 = vxor.u32 %v1337_v50, %v1336_v43 }
 0x1ee   :  { %v1552_v28 = vsel %vm790_vm10, 1.0, %v1782_v40  ;;  %v1227_v29 = vsub.f32 1.0, %v1587_v27  ;;  %1589 = vmatmul.msk.bf16.vlgmr.msra.gmra.mxu3 %vm1588_vm11, %v1783_v46  ;;  %vm1553_vm12 = vmpackc.low %vm790_vm10, %vm790_vm10  ;;  %v1020_v21 = vshrl.u32 %v1019_v8, 16 }
 0x1ef   :  { %v793_v30 = vsub.f32 1.0, %v1552_v28  ;;  %1554 = vmatmul.msk.bf16.vlgmr.msrb.gmra.mxu2 %vm1553_vm12, %v1783_v46  ;;  %v1339_v0 = vshrl.u32 %v1338_v54, 8 }
 0x1f0   :  { %v1228_v32 = vmul.f32 %v1227_v29, %v2086_v14  ;;  %1288 = vmatpush.bf16.msrb.mxu2 %v1952_v23  ;;  %v1021_v52 = vxor.u32 %v1020_v21, %v1019_v8 }
 0x1f1   :  { %v794_v33 = vmul.f32 %v793_v30, %v2088_v17  ;;  %v1340_v63 = vshrl.u32 %v1339_v0, 16  ;;  %v1341_v2 = vand.u32 65535, %v1339_v0 }
 0x1f2   :  { %v1308_v56 = vmul.f32 0.8187308, %v1228_v32 }
 0x1f3   :  { %v874_v36 = vmul.f32 0.8187308, %v794_v33  ;;  %v1342_v4 = vcvt.s32.f32 %v1340_v63  ;;  %v1344_v18 = vcvt.s32.f32 %v1341_v2 }
 0x1f4   :  { %v1309_v37 = vadd.f32 %v1308_v56, %v1895_v10  ;;  %v872_v41 = vpop.f32.mrf.mxu0  ;;  %1289 = vmatpush.bf16.msrb.mxu2 %v1960_v25  ;;  %v904_v10 = vxor.u32 %v903_v51, %v902_v42 }
 0x1f5   :  { %v2110_v44 = vadd.f32 %v874_v36, %v871_v35  ;;  %v1343_v60 = vmul.f32 65536.0, %v1342_v4 }
 0x1f6   :  { %v1595_v14 = vadd.f32 -1.0, %v1309_v37  ;;  %v905_v58 = vshrl.u32 %v904_v10, 8 }
 0x1f7   :  { %v1560_v49 = vadd.f32 -1.0, %v2110_v44  ;;  %v1345_v56 = vadd.f32 %v1344_v18, %v1343_v60 }
 0x1f8   :  { %v1596_v15 = vmul.f32 -1.442695, %v1595_v14  ;;  %1290 = vmatpush.bf16.msrb.mxu2 %v1970_v31  ;;  %v906_v1 = vshrl.u32 %v905_v58, 16  ;;  %v907_v16 = vand.u32 65535, %v905_v58  ;;  %v1022_v14 = vmul.u32 2146121005, %v1021_v52 }
 0x1f9   :  { %v1561_v17 = vmul.f32 -1.442695, %v1560_v49 }
 0x1fa   :  { %1671 = vpow2.f32 %v1596_v15  ;;  %v908_v3 = vcvt.s32.f32 %v906_v1  ;;  %v910_v28 = vcvt.s32.f32 %v907_v16  ;;  %v1023_v50 = vshrl.u32 %v1022_v14, 15 }
 0x1fb   :  { %1673 = vpow2.f32 %v1561_v17 }
 0x1fc   :  { %1291 = vmatpush.bf16.msrb.mxu2 %v1978_v39  ;;  %v909_v19 = vmul.f32 65536.0, %v908_v3 }
 0x1fe   :  { %v911_v36 = vadd.f32 %v910_v28, %v909_v19 }
 0x200   :  { %v1672_v55 = vpop.eup %1671  ;;  %1292 = vmatpush.bf16.msrb.mxu2 %v1985_v53 }
 0x201   :  { %v1674_v57 = vpop.eup %1673  ;;  %v1314_v59 = vadd.f32 1.0, %v1672_v55  ;;  %v1024_v55 = vxor.u32 %v1023_v50, %v1022_v14 }
 0x202   :  { %v880_v61 = vadd.f32 1.0, %v1674_v57 }
 0x203   :  { %1675 = vrcp.f32 %v1314_v59  ;;  %v1326_v20 = vand.u32 2147483648, %v1314_v59  ;;  %v1324_v26 = vand.u32 2147483647, %v1314_v59  ;;  %vm1320_vm15 = vweird.f32 %v1314_v59 }
 0x204   :  { %1677 = vrcp.f32 %v880_v61  ;;  %1293 = vmatpush.bf16.msrb.mxu2 %v1992_v62  ;;  %v892_v22 = vand.u32 2147483648, %v880_v61  ;;  %v890_v27 = vand.u32 2147483647, %v880_v61  ;;  %vm886_vm0 = vweird.f32 %v880_v61 }
 0x205   :  { %v1327_v32 = vor.u32 1.1754944e-38, %v1326_v20  ;;  %vm1325_vm3 = vcmp.eq.f32.partialorder %v1324_v26, 8.507059e+37  ;;  %v1025_v58 = vmul.u32 2221713035, %v1024_v55 }
 0x206   :  { %v893_v33 = vor.u32 1.1754944e-38, %v892_v22  ;;  %vm891_vm4 = vcmp.eq.f32.partialorder %v890_v27, 8.507059e+37 }
 0x207   :  { %v1026_v1 = vshrl.u32 %v1025_v58, 16 }
 0x208   :  { %1294 = vmatpush.bf16.msrb.mxu2 %v2001_v5 }
 0x209   :  { %v1676_v6 = vpop.eup %1675 }
 0x20a   :  { %v1678_v9 = vpop.eup %1677  ;;  %v1316_v11 = vmul.f32 %v1676_v6, %v1314_v59  ;;  %vm1321_vm13 = vweird.f32 %v1676_v6 }
 0x20b   :  { %v882_v12 = vmul.f32 %v1678_v9, %v880_v61  ;;  %vm887_vm14 = vweird.f32 %v1678_v9  ;;  %vm1322_vm1 = vmor %vm1320_vm15, %vm1321_vm13 }
 0x20c   :  { %v1317_v38 = vsub.f32 1.0, %v1316_v11  ;;  %1295 = vmatpush.bf16.msrb.mxu2 %v2015_v13  ;;  %vm888_vm2 = vmor %vm886_vm0, %vm887_vm14 }
 0x20d   :  { %v883_v45 = vsub.f32 1.0, %v882_v12 }
 0x20e   :  { %v1318_v24 = vmul.f32 %v1676_v6, %v1317_v38 }
 0x20f   :  { %v884_v48 = vmul.f32 %v1678_v9, %v883_v45 }
 0x210   :  { %v1319_v29 = vadd.f32 %v1676_v6, %v1318_v24 }
 0x211   :  { %v885_v30 = vadd.f32 %v1678_v9, %v884_v48 }
 0x212   :  { %v1323_v34 = vsel %vm1322_vm1, %v1676_v6, %v1319_v29 }
 0x213   :  { %v889_v35 = vsel %vm888_vm2, %v1678_v9, %v885_v30  ;;  %v1328_v37 = vsel %vm1325_vm3, %v1327_v32, %v1323_v34 }
 0x214   :  { %v894_v41 = vsel %vm891_vm4, %v893_v33, %v889_v35  ;;  %v1346_v43 = vmul.f32 16777216.0, %v1328_v37 }
 0x215   :  { %v912_v42 = vmul.f32 16777216.0, %v894_v41 }
 0x216   :  { %vm1347_vm5 = vcmp.lt.f32.partialorder %v1345_v56, %v1346_v43 }
 0x217   :  { %vm913_vm6 = vcmp.lt.f32.partialorder %v911_v36, %v912_v42  ;;  %vm1598_vm7 = vmpackc.low %vm1347_vm5, %vm1347_vm5 }
 0x218   :  { %v1562_v49 = vsel %vm913_vm6, 1.0, %v1782_v40  ;;  %1599 = vmatmul.msk.bf16.vlgmr.msrb.gmra.mxu0 %vm1598_vm7, %v1783_v46  ;;  %vm1563_vm8 = vmpackc.low %vm913_vm6, %vm913_vm6 }
 0x219   :  { %v916_v15 = vsub.f32 1.0, %v1562_v49  ;;  %1564 = vmatmul.msk.bf16.vlgmr.msrb.gmra.mxu1 %vm1563_vm8, %v1783_v46 }
 0x21a   :  { %1407 = vmatpush.bf16.msrb.mxu1 %v1952_v23  ;;  %v1027_v23 = vxor.u32 %v1026_v1, %v1025_v58 }
 0x21b   :  { %v917_v17 = vmul.f32 %v916_v15, %v2110_v44 }
 0x21c   :  { %v562_v51 = vpop.f32.mrf.mxu2  ;;  %v1028_v6 = vshrl.u32 %v1027_v23, 8 }
 0x21d   :  { %v993_v54 = vpop.f32.mrf.mxu3  ;;  %v997_v10 = vmul.f32 0.8187308, %v917_v17 }
 0x21e   :  { %v994_v0 = vadd.f32 %v2008_v7, %v993_v54  ;;  %1408 = vmatpush.bf16.msrb.mxu1 %v1960_v25  ;;  %v1029_v25 = vshrl.u32 %v1028_v6, 16  ;;  %v1030_v11 = vand.u32 65535, %v1028_v6 }
 0x220   :  { %v998_v57 = vadd.f32 %v997_v10, %v994_v0  ;;  %v1031_v8 = vcvt.s32.f32 %v1029_v25  ;;  %v1033_v60 = vcvt.s32.f32 %v1030_v11 }
 0x222   :  { %v1570_v59 = vadd.f32 -1.0, %v998_v57  ;;  %1409 = vmatpush.bf16.msrb.mxu1 %v1970_v31  ;;  %v1142_v31 = vxor.u32 1942681781, %v1843_v47  ;;  %v1032_v16 = vmul.f32 65536.0, %v1031_v8 }
 0x224   :  { %v1571_v61 = vmul.f32 -1.442695, %v1570_v59  ;;  %v564_v63 = vpop.f32.mrf.mxu2  ;;  %v1034_v21 = vadd.f32 %v1033_v60, %v1032_v16 }
 0x225   :  { %v995_v2 = vpop.f32.mrf.mxu3  ;;  %v1265_v63 = vxor.u32 2956586023, %v1843_v47 }
 0x226   :  { %1679 = vpow2.f32 %v1571_v61  ;;  %1410 = vmatpush.bf16.msrb.mxu1 %v1978_v39  ;;  %v1143_v39 = vshrl.u32 %v1142_v31, 16 }
 0x228   :  { %v1144_v18 = vxor.u32 %v1143_v39, %v1142_v31 }
 0x22a   :  { %1411 = vmatpush.bf16.msrb.mxu1 %v1985_v53  ;;  %v2137_v53 = vld [vmem:[%s2197_s6] ss:$0 sm:$0xff]  ;;  %v1145_v24 = vmul.u32 2146121005, %v1144_v18 }
 0x22b   :  { %v563_v19 = vadd.f32 %v2137_v53, %v562_v51 }
 0x22c   :  { %v1680_v44 = vpop.eup %1679  ;;  %v1146_v52 = vshrl.u32 %v1145_v24, 15 }
 0x22d   :  { %v1003_v4 = vadd.f32 1.0, %v1680_v44  ;;  %v566_v27 = vmul.f32 0.2, %v563_v19 }
 0x22e   :  { %1412 = vmatpush.bf16.msrb.mxu1 %v1992_v62  ;;  %v1147_v37 = vxor.u32 %v1146_v52, %v1145_v24 }
 0x22f   :  { %1681 = vrcp.f32 %v1003_v4  ;;  %v1015_v62 = vand.u32 2147483648, %v1003_v4  ;;  %vm1009_vm10 = vweird.f32 %v1003_v4  ;;  %v2143_v35 = vmul.f32 0.1, %v566_v27 }
 0x230   :  { %v1148_v17 = vmul.u32 2221713035, %v1147_v37 }
 0x232   :  { %1413 = vmatpush.bf16.msrb.mxu1 %v2001_v5  ;;  %v1013_v5 = vand.u32 2147483647, %v1003_v4  ;;  %v1149_v55 = vshrl.u32 %v1148_v17, 16 }
 0x234   :  { %vm1014_vm12 = vcmp.eq.f32.partialorder %v1013_v5, 8.507059e+37 }
 0x235   :  { %v1682_v3 = vpop.eup %1681 }
 0x236   :  { %v1005_v9 = vmul.f32 %v1682_v3, %v1003_v4  ;;  %1414 = vmatpush.bf16.msrb.mxu1 %v2015_v13  ;;  %vm1010_vm9 = vweird.f32 %v1682_v3  ;;  %v1016_v13 = vor.u32 1.1754944e-38, %v1015_v62  ;;  %v1266_v4 = vshrl.u32 %v1265_v63, 16 }
 0x237   :  { %vm1011_vm11 = vmor %vm1009_vm10, %vm1010_vm9 }
 0x238   :  { %v1006_v12 = vsub.f32 1.0, %v1005_v9  ;;  %v1267_v11 = vxor.u32 %v1266_v4, %v1265_v63 }
 0x23a   :  { %v1007_v38 = vmul.f32 %v1682_v3, %v1006_v12  ;;  %v1268_v5 = vmul.u32 2146121005, %v1267_v11 }
 0x23c   :  { %v1008_v45 = vadd.f32 %v1682_v3, %v1007_v38 }
 0x23e   :  { %v1012_v20 = vsel %vm1011_vm11, %v1682_v3, %v1008_v45  ;;  %v1269_v45 = vshrl.u32 %v1268_v5, 15 }
 0x23f   :  { %v1017_v22 = vsel %vm1014_vm12, %v1016_v13, %v1012_v20 }
 0x240   :  { %v1035_v26 = vmul.f32 16777216.0, %v1017_v22  ;;  %v682_v48 = vpop.f32.mrf.mxu1  ;;  %v2161_v22 = vld [vmem:[%s2195_s4] ss:$0 sm:$0xff]  ;;  %s1784_s4 = smov [#allocation7]  }
 0x241   :  { %v683_v28 = vadd.f32 %v2137_v53, %v682_v48  ;;  %v1116_v29 = vpop.f32.mrf.mxu0  ;;  %s1447_s22 = sshll.u32 %s1784_s4, 4  ;;  %s1448_s22 = int_to_ptr.vmem [resolvable:$true] %s1447_s22 }
 0x242   :  { %vm1036_vm13 = vcmp.lt.f32.partialorder %v1034_v21, %v1035_v26  ;;  %v1117_v41 = vadd.f32 %v2008_v7, %v1116_v29  ;;  %v1150_v7 = vxor.u32 %v1149_v55, %v1148_v17  ;;  %v1270_v21 = vxor.u32 %v1269_v45, %v1268_v5 }
 0x243   :  { %v1572_v30 = vsel %vm1036_vm13, 1.0, %v1782_v40  ;;  %v686_v32 = vsub.f32 %v683_v28, %v566_v27  ;;  %vm1573_vm14 = vmpackc.low %vm1036_vm13, %vm1036_vm13 }
 0x244   :  { %v1039_v33 = vsub.f32 1.0, %v1572_v30  ;;  %1574 = vmatmul.msk.bf16.vlgmr.msra.gmra.mxu2 %vm1573_vm14, %v1783_v46  ;;  %v1151_v59 = vshrl.u32 %v1150_v7, 8  ;;  %v1271_v29 = vmul.u32 2221713035, %v1270_v21 }
 0x245   :  { %v687_v34 = vmul.f32 0.2, %v686_v32 }
 0x246   :  { %v1040_v56 = vmul.f32 %v1039_v33, %v998_v57  ;;  %v1152_v61 = vshrl.u32 %v1151_v59, 16  ;;  %v1153_v44 = vand.u32 65535, %v1151_v59 }
 0x247   :  { %v2145_v36 = vadd.f32 %v687_v34, %v566_v27  ;;  %v1272_v34 = vshrl.u32 %v1271_v29, 16 }
 0x248   :  { %v1120_v43 = vmul.f32 0.8187308, %v1040_v56  ;;  %v684_v42 = vpop.f32.mrf.mxu1  ;;  %v1154_v2 = vcvt.s32.f32 %v1152_v61  ;;  %v1156_v9 = vcvt.s32.f32 %v1153_v44 }
 0x249   :  { %v689_v14 = vsub.f32 %v2145_v36, %v2143_v35  ;;  %v1118_v49 = vpop.f32.mrf.mxu0  ;;  %v1273_v42 = vxor.u32 %v1272_v34, %v1271_v29 }
 0x24a   :  { %v1121_v15 = vadd.f32 %v1120_v43, %v1117_v41  ;;  %v1155_v31 = vmul.f32 65536.0, %v1154_v2 }
 0x24b   :  { %v690_v50 = vmul.f32 0.1, %v689_v14  ;;  %v1274_v17 = vshrl.u32 %v1273_v42, 8 }
 0x24c   :  { %v1580_v51 = vadd.f32 -1.0, %v1121_v15  ;;  %v1157_v16 = vadd.f32 %v1156_v9, %v1155_v31 }
 0x24d   :  { %v2151_v54 = vadd.f32 %v690_v50, %v2143_v35 }
 0x24e   :  { %v1581_v10 = vmul.f32 -1.442695, %v1580_v51 }
 0x24f   :  { %v692_v0 = vmax.f32 %v2143_v35, %v2151_v54 }
 0x250   :  { %1683 = vpow2.f32 %v1581_v10  ;;  %v1275_v10 = vshrl.u32 %v1274_v17, 16 }
 0x252   :  { %v1277_v7 = vcvt.s32.f32 %v1275_v10 }
 0x256   :  { %v1684_v57 = vpop.eup %1683 }
 0x257   :  { %v1126_v58 = vadd.f32 1.0, %v1684_v57 }
 0x259   :  { %1685 = vrcp.f32 %v1126_v58  ;;  %v1138_v25 = vand.u32 2147483648, %v1126_v58  ;;  %v1136_v8 = vand.u32 2147483647, %v1126_v58  ;;  %vm1132_vm0 = vweird.f32 %v1126_v58 }
 0x25b   :  { %v1139_v12 = vor.u32 1.1754944e-38, %v1138_v25  ;;  %vm1137_vm2 = vcmp.eq.f32.partialorder %v1136_v8, 8.507059e+37 }
 0x25f   :  { %v1686_v1 = vpop.eup %1685 }
 0x260   :  { %v1128_v23 = vmul.f32 %v1686_v1, %v1126_v58  ;;  %vm1133_vm15 = vweird.f32 %v1686_v1  ;;  %v1276_v58 = vand.u32 65535, %v1274_v17 }
 0x261   :  { %vm1134_vm1 = vmor %vm1132_vm0, %vm1133_vm15 }
 0x262   :  { %v1129_v6 = vsub.f32 1.0, %v1128_v23  ;;  %v1279_v44 = vcvt.s32.f32 %v1276_v58 }
 0x264   :  { %v1130_v3 = vmul.f32 %v1686_v1, %v1129_v6 }
 0x266   :  { %v1131_v39 = vadd.f32 %v1686_v1, %v1130_v3 }
 0x268   :  { %v1135_v62 = vsel %vm1134_vm1, %v1686_v1, %v1131_v39  ;;  %v1278_v1 = vmul.f32 65536.0, %v1277_v7  ;;  %vm1427_vm1 = vcmask 80896  }
 0x269   :  { %v1140_v38 = vsel %vm1137_vm2, %v1139_v12, %v1135_v62 }
 0x26a   :  { %v1158_v60 = vmul.f32 16777216.0, %v1140_v38 }
 0x26c   :  { %vm1159_vm3 = vcmp.lt.f32.partialorder %v1157_v16, %v1158_v60 }
 0x26d   :  { %v1582_v18 = vsel %vm1159_vm3, 1.0, %v1782_v40  ;;  %vm1583_vm4 = vmpackc.low %vm1159_vm3, %vm1159_vm3 }
 0x26e   :  { %v1162_v19 = vsub.f32 1.0, %v1582_v18  ;;  %1584 = vmatmul.msk.bf16.vlgmr.msra.gmra.mxu1 %vm1583_vm4, %v1783_v46 }
 0x270   :  { %v1163_v13 = vmul.f32 %v1162_v19, %v1121_v15 }
 0x271   :  { %v1239_v20 = vpop.f32.mrf.mxu3 }
 0x272   :  { %v1240_v24 = vadd.f32 %v2161_v22, %v1239_v20  ;;  %v1243_v26 = vmul.f32 0.8187308, %v1163_v13  ;;  %v805_v48 = vpop.f32.mrf.mxu2 }
 0x273   :  { %v806_v27 = vadd.f32 %v2137_v53, %v805_v48 }
 0x274   :  { %v1244_v28 = vadd.f32 %v1243_v26, %v1240_v24 }
 0x275   :  { %v809_v30 = vsub.f32 %v806_v27, %v2145_v36 }
 0x276   :  { %v1590_v32 = vadd.f32 -1.0, %v1244_v28 }
 0x277   :  { %v810_v52 = vmul.f32 0.2, %v809_v30 }
 0x278   :  { %v1591_v33 = vmul.f32 -1.442695, %v1590_v32 }
 0x279   :  { %v811_v56 = vadd.f32 %v810_v52, %v2145_v36  ;;  %v1241_v37 = vpop.f32.mrf.mxu3  ;;  %v1386_v36 = vxor.u32 3970490265, %v1843_v47  ;;  %v1280_v47 = vadd.f32 %v1279_v44, %v1278_v1 }
 0x27a   :  { %1687 = vpow2.f32 %v1591_v33  ;;  %v807_v41 = vpop.f32.mrf.mxu2 }
 0x27b   :  { %v812_v43 = vsub.f32 %v811_v56, %v2151_v54  ;;  %v1387_v59 = vshrl.u32 %v1386_v36, 16 }
 0x27d   :  { %v813_v14 = vmul.f32 0.1, %v812_v43  ;;  %v1388_v4 = vxor.u32 %v1387_v59, %v1386_v36 }
 0x27f   :  { %v814_v49 = vadd.f32 %v813_v14, %v2151_v54  ;;  %v1389_v25 = vmul.u32 2146121005, %v1388_v4 }
 0x280   :  { %v1688_v15 = vpop.eup %1687 }
 0x281   :  { %v1249_v50 = vadd.f32 1.0, %v1688_v15  ;;  %v2172_v51 = vmax.f32 %v692_v0, %v814_v49  ;;  %v1390_v39 = vshrl.u32 %v1389_v25, 15 }
 0x283   :  { %1689 = vrcp.f32 %v1249_v50  ;;  %v1261_v63 = vand.u32 2147483648, %v1249_v50  ;;  %v1259_v23 = vand.u32 2147483647, %v1249_v50  ;;  %vm1255_vm6 = vweird.f32 %v1249_v50 }
 0x284   :  { %v1391_v5 = vxor.u32 %v1390_v39, %v1389_v25 }
 0x285   :  { %v1262_v54 = vor.u32 1.1754944e-38, %v1261_v63  ;;  %vm1260_vm8 = vcmp.eq.f32.partialorder %v1259_v23, 8.507059e+37 }
 0x289   :  { %v1690_v55 = vpop.eup %1689 }
 0x28a   :  { %v1251_v57 = vmul.f32 %v1690_v55, %v1249_v50  ;;  %vm1256_vm5 = vweird.f32 %v1690_v55 }
 0x28b   :  { %vm1257_vm7 = vmor %vm1255_vm6, %vm1256_vm5 }
 0x28c   :  { %v1252_v61 = vsub.f32 1.0, %v1251_v57 }
 0x28e   :  { %v1253_v2 = vmul.f32 %v1690_v55, %v1252_v61 }
 0x290   :  { %v1254_v35 = vadd.f32 %v1690_v55, %v1253_v2 }
 0x292   :  { %v1258_v0 = vsel %vm1257_vm7, %v1690_v55, %v1254_v35 }
 0x293   :  { %v1263_v6 = vsel %vm1260_vm8, %v1262_v54, %v1258_v0 }
 0x294   :  { %v1281_v31 = vmul.f32 16777216.0, %v1263_v6 }
 0x295   :  { %v1360_v3 = vpop.f32.mrf.mxu0 }
 0x296   :  { %vm1282_vm9 = vcmp.lt.f32.partialorder %v1280_v47, %v1281_v31  ;;  %v928_v8 = vpop.f32.mrf.mxu1  ;;  %v1361_v60 = vadd.f32 %v2161_v22, %v1360_v3 }
 0x297   :  { %v1592_v9 = vsel %vm1282_vm9, 1.0, %v1782_v40  ;;  %v929_v11 = vadd.f32 %v2137_v53, %v928_v8  ;;  %vm1593_vm10 = vmpackc.low %vm1282_vm9, %vm1282_vm9  ;;  %v1392_v40 = vmul.u32 2221713035, %v1391_v5 }
 0x298   :  { %v1285_v12 = vsub.f32 1.0, %v1592_v9  ;;  %1594 = vmatmul.msk.bf16.vlgmr.msrb.gmra.mxu2 %vm1593_vm10, %v1783_v46 }
 0x299   :  { %v932_v62 = vsub.f32 %v929_v11, %v811_v56  ;;  %v1393_v29 = vshrl.u32 %v1392_v40, 16 }
 0x29a   :  { %v1286_v16 = vmul.f32 %v1285_v12, %v1244_v28 }
 0x29b   :  { %v933_v38 = vmul.f32 0.2, %v932_v62  ;;  %v1394_v28 = vxor.u32 %v1393_v29, %v1392_v40 }
 0x29c   :  { %v1364_v18 = vmul.f32 0.8187308, %v1286_v16 }
 0x29d   :  { %v934_v45 = vadd.f32 %v933_v38, %v811_v56  ;;  %v1362_v19 = vpop.f32.mrf.mxu0  ;;  %v1395_v33 = vshrl.u32 %v1394_v28, 8 }
 0x29e   :  { %v1365_v13 = vadd.f32 %v1364_v18, %v1361_v60  ;;  %v930_v20 = vpop.f32.mrf.mxu1 }
 0x29f   :  { %v935_v21 = vsub.f32 %v934_v45, %v814_v49  ;;  %v1396_v22 = vshrl.u32 %v1395_v33, 16  ;;  %v1397_v41 = vand.u32 65535, %v1395_v33 }
 0x2a0   :  { %v1600_v24 = vadd.f32 -1.0, %v1365_v13 }
 0x2a1   :  { %v936_v26 = vmul.f32 0.1, %v935_v21  ;;  %v1398_v56 = vcvt.s32.f32 %v1396_v22  ;;  %v1400_v50 = vcvt.s32.f32 %v1397_v41 }
 0x2a2   :  { %v1601_v48 = vmul.f32 -1.442695, %v1600_v24 }
 0x2a3   :  { %v937_v27 = vadd.f32 %v936_v26, %v814_v49  ;;  %v1399_v14 = vmul.f32 65536.0, %v1398_v56 }
 0x2a4   :  { %1691 = vpow2.f32 %v1601_v48 }
 0x2a5   :  { %v938_v30 = vmax.f32 %v2172_v51, %v937_v27  ;;  %v1401_v36 = vadd.f32 %v1400_v50, %v1399_v14 }
 0x2aa   :  { %v1692_v32 = vpop.eup %1691 }
 0x2ab   :  { %v1370_v52 = vadd.f32 1.0, %v1692_v32 }
 0x2ad   :  { %1693 = vrcp.f32 %v1370_v52  ;;  %v1382_v42 = vand.u32 2147483648, %v1370_v52  ;;  %v1380_v49 = vand.u32 2147483647, %v1370_v52  ;;  %vm1376_vm12 = vweird.f32 %v1370_v52 }
 0x2af   :  { %v1383_v51 = vor.u32 1.1754944e-38, %v1382_v42  ;;  %vm1381_vm14 = vcmp.eq.f32.partialorder %v1380_v49, 8.507059e+37 }
 0x2b3   :  { %v1694_v34 = vpop.eup %1693 }
 0x2b4   :  { %v1372_v37 = vmul.f32 %v1694_v34, %v1370_v52  ;;  %vm1377_vm11 = vweird.f32 %v1694_v34 }
 0x2b5   :  { %vm1378_vm13 = vmor %vm1376_vm12, %vm1377_vm11 }
 0x2b6   :  { %v1373_v43 = vsub.f32 1.0, %v1372_v37 }
 0x2b8   :  { %v1374_v15 = vmul.f32 %v1694_v34, %v1373_v43 }
 0x2ba   :  { %v1375_v17 = vadd.f32 %v1694_v34, %v1374_v15 }
 0x2bc   :  { %v1379_v10 = vsel %vm1378_vm13, %v1694_v34, %v1375_v17 }
 0x2bd   :  { %v1384_v55 = vsel %vm1381_vm14, %v1383_v51, %v1379_v10 }
 0x2be   :  { %v1402_v7 = vmul.f32 16777216.0, %v1384_v55 }
 0x2c0   :  { %vm1403_vm15 = vcmp.lt.f32.partialorder %v1401_v36, %v1402_v7 }
 0x2c1   :  { %vm1603_vm0 = vmpackc.low %vm1403_vm15, %vm1403_vm15 }
 0x2c2   :  { %1604 = vmatmul.msk.bf16.vlgmr.msrb.gmra.mxu1 %vm1603_vm0, %v1783_v46 }
 0x2c7   :  { %v1051_v57 = vpop.f32.mrf.mxu2 }
 0x2c8   :  { %v1052_v58 = vadd.f32 %v2137_v53, %v1051_v57 }
 0x2ca   :  { %v1055_v59 = vsub.f32 %v1052_v58, %v934_v45 }
 0x2cc   :  { %v1056_v61 = vmul.f32 0.2, %v1055_v59 }
 0x2ce   :  { %v1057_v63 = vadd.f32 %v1056_v61, %v934_v45 }
 0x2cf   :  { %v1053_v1 = vpop.f32.mrf.mxu2 }
 0x2d0   :  { %v1058_v2 = vsub.f32 %v1057_v63, %v937_v27 }
 0x2d2   :  { %v1059_v23 = vmul.f32 0.1, %v1058_v2 }
 0x2d4   :  { %v1060_v44 = vadd.f32 %v1059_v23, %v937_v27 }
 0x2d6   :  { %v1061_v4 = vmax.f32 %v938_v30, %v1060_v44 }
 0x2eb   :  { %v1174_v35 = vpop.f32.mrf.mxu1 }
 0x2ec   :  { %v1175_v54 = vadd.f32 %v2137_v53, %v1174_v35 }
 0x2ee   :  { %v1178_v0 = vsub.f32 %v1175_v54, %v1057_v63 }
 0x2f0   :  { %v1179_v47 = vmul.f32 0.2, %v1178_v0 }
 0x2f2   :  { %v1180_v6 = vadd.f32 %v1179_v47, %v1057_v63 }
 0x2f3   :  { %v1176_v25 = vpop.f32.mrf.mxu1 }
 0x2f4   :  { %v1181_v31 = vsub.f32 %v1180_v6, %v1060_v44 }
 0x2f6   :  { %v1182_v46 = vmul.f32 0.1, %v1181_v31 }
 0x2f8   :  { %v1183_v3 = vadd.f32 %v1182_v46, %v1060_v44 }
 0x2fa   :  { %v1184_v8 = vmax.f32 %v1061_v4, %v1183_v3 }
 0x31b   :  { %v1297_v9 = vpop.f32.mrf.mxu2 }
 0x31c   :  { %v1298_v11 = vadd.f32 %v2137_v53, %v1297_v9 }
 0x31e   :  { %v1301_v39 = vsub.f32 %v1298_v11, %v1180_v6 }
 0x320   :  { %v1302_v12 = vmul.f32 0.2, %v1301_v39 }
 0x322   :  { %v1303_v62 = vadd.f32 %v1302_v12, %v1180_v6 }
 0x323   :  { %v1299_v16 = vpop.f32.mrf.mxu2 }
 0x324   :  { %v1304_v38 = vsub.f32 %v1303_v62, %v1183_v3 }
 0x326   :  { %v1305_v5 = vmul.f32 0.1, %v1304_v38 }
 0x328   :  { %v1306_v60 = vadd.f32 %v1305_v5, %v1183_v3 }
 0x32a   :  { %v1307_v18 = vmax.f32 %v1184_v8, %v1306_v60 }
 0x33f   :  { %v1416_v45 = vpop.f32.mrf.mxu1 }
 0x340   :  { %v1417_v19 = vadd.f32 %v2137_v53, %v1416_v45 }
 0x342   :  { %v1420_v13 = vsub.f32 %v1417_v19, %v1303_v62 }
 0x344   :  { %v1421_v20 = vmul.f32 0.2, %v1420_v13 }
 0x346   :  { %v1422_v21 = vadd.f32 %v1421_v20, %v1303_v62 }
 0x347   :  { %v1418_v40 = vpop.f32.mrf.mxu1 }
 0x348   :  { %v1423_v24 = vsub.f32 %v1422_v21, %v1306_v60 }
 0x34a   :  { %v1424_v26 = vmul.f32 0.1, %v1423_v24 }
 0x34c   :  { %v1425_v48 = vadd.f32 %v1424_v26, %v1306_v60 }
 0x34e   :  { %v1426_v27 = vmax.f32 %v1307_v18, %v1425_v48 }
 0x350   :  { %v1428_v29 = vsel %vm1427_vm1, %v1426_v27, -inf }
 0x351   :  { %1429 = vmax.xlane.f32.xlu0 %v1428_v29 }
 0x3c4   :  { %v1430_v30 = vpop.xlane.xlu0 %1429 }
 0x3c5   :  { %v1431_v28 = vsub.f32 %v1426_v27, %v1430_v30 }
 0x3c7   :  { %v1432_v32 = vmul.f32 1.442695, %v1431_v28 }
 0x3c9   :  { %1695 = vpow2.f32 %v1432_v32 }
 0x3cf   :  { %v1696_v52 = vpop.eup %1695 }
 0x3d0   :  { %v1434_v33 = vsel %vm1427_vm1, %v1696_v52, 0.0 }
 0x3d1   :  { %1435 = vadd.xlane.f32.xlu0 %v1434_v33 }
 0x444   :  { %v1436_v53 = vpop.xlane.xlu0 %1435 }
 0x445   :  { %1697 = vlog2.f32 %v1436_v53 }
 0x44b   :  { %v1698_v22 = vpop.eup %1697 }
 0x44c   :  { %v1438_v34 = vmul.f32 0.6931472, %v1698_v22 }
 0x44e   :  { %v1439_v56 = vadd.f32 %v1438_v34, %v1430_v30 }
 0x450   :  { %v1440_v37 = vsub.f32 %v1426_v27, %v1439_v56 }
 0x452   :  { %1441 = vst.msk [vmem:[#allocation7] sm:$0xff] %vm1427_vm1, %v1440_v37 }
 0x453   :  { %1452 = dma.vmem_to_hbm [thread:$0]  %s1448_s22, 128, %s1450_s24, [#allocation4]  }
 0x454   :  { %1776 = dma.done.wait [#allocation4], 128  }
 0x455   :  { %1777 = vsyncadd [#allocation4], 4294967168 }
 0x456   :  { %1457 = vsyncpa [#allocation3], 1 }
 0x457   :  { %1458 = vsyncpa [#allocation6], 1 }
 0x458   :  { %1459 = vsyncpa [#allocation4], 1 }

</bundles_post_ra>
